<compile_context>
chip_gen: v5e
topology: v5e:2x2
jax: 0.10.0
libtpu: 0.0.40
codegen_flags: <defaults>
</compile_context>

<pallas_src>
import functools

import jax
import jax.numpy as jnp
from jax import lax
from jax.experimental import pallas as pl
from jax.experimental.pallas import tpu as pltpu


_BP = 8  # padded batch = one full sublane group


# ----------------------------------------------------------------------------
# Fused Pallas kernel:
#   LSTM1 -> (drop1 = id) -> LSTM2 -> last step -> (drop2 = id) -> FC
# implemented as a (T+1)-stage wavefront over both layers.
# ----------------------------------------------------------------------------
def fused_lstm_fc_kernel(x_ref, w_in_ref, w_rec_ref, tail_ref, out_ref, *, seq_len):
    """
    x_ref    : (T*Bp, D)   time-major input, batch padded to Bp=8
    w_in_ref : (D, 8H)     x -> gates, gate-grouped cols [i1 i2 f1 f2 g1 g2 o1 o2]
                           (layer-2 slots are zero)
    w_rec_ref: (2H, 8H)    blocked recurrent weight:
                             rows 0:H  (h1) -> [whh1 | wih2] per gate group
                             rows H:2H (h2) -> [  0  | whh2] per gate group
    tail_ref : (8+2H, 8H)  row 0 = combined gate bias (b1|b2, gate-grouped),
                           row 1 = fc bias (col-padded),
                           rows 8+H:8+2H = fc weight^T (layer-2 rows; layer-1
                           rows and cols >= O are zero)
    out_ref  : (B, O)      model output (B = true batch <= Bp)
    """
    T = seq_len
    BP = x_ref.shape[0] // T
    H2 = w_rec_ref.shape[0]          # 2H
    H = H2 // 2
    B, O = out_ref.shape

    w_rec = w_rec_ref[...]           # (2H, 8H) held in vregs across the loop
    bias = tail_ref[0:1, :]          # (1, 8H)

    # Hoisted layer-1 input projection: one (T*Bp, D)x(D, 8H) matmul, entirely
    # off the serial recurrence critical path.  Layer-2 gate slots get only b2.
    pre_all = jnp.dot(x_ref[...], w_in_ref[...],
                      preferred_element_type=jnp.float32) + bias   # (T*Bp, 8H)

    def dual_cell(gates, c12):
        # Update BOTH cells at once.  gates (Bp, 8H) grouped per gate type;
        # state (Bp, 2H) = [layer-1 | layer-2].  PyTorch gate order i, f, g, o.
        sg = jax.nn.sigmoid(gates)   # one full-width EUP pass
        tg = jnp.tanh(gates)         # one full-width EUP pass
        i_a = sg[:, 0 * H2:1 * H2]
        f_a = sg[:, 1 * H2:2 * H2]
        g_a = tg[:, 2 * H2:3 * H2]
        o_a = sg[:, 3 * H2:4 * H2]
        c_new = f_a * c12 + i_a * g_a
        h_new = o_a * jnp.tanh(c_new)
        return h_new, c_new

    lane = lax.broadcasted_iota(jnp.int32, (BP, H2), 1)
    layer1_only = lane < H

    # ---- Stage 0: layer-1 step 0 (all hidden state is zero -> no recurrent
    # matmul); mask the bogus layer-2 "step -1" half back to zero.
    h12, c12 = dual_cell(pre_all[0:BP, :], jnp.zeros((BP, H2), jnp.float32))
    h12 = jnp.where(layer1_only, h12, 0.0)
    c12 = jnp.where(layer1_only, c12, 0.0)

    # ---- Stages 1..T-1 (wavefront): layer-1 step s and layer-2 step s-1 are
    # produced by ONE matmul on h12 = [h1_{s-1} | h2_{s-2}].  T is tiny and
    # static: fully unroll so the scheduler overlaps stages.
    # TODO(synk): if the bundle dump shows vreg spills, re-read w_rec_ref here
    # instead of holding it in vregs (vector-load slots have slack).
    for s in range(1, T):
        gates = pre_all[s * BP:(s + 1) * BP, :] + jnp.dot(
            h12, w_rec, preferred_element_type=jnp.float32)
        h12, c12 = dual_cell(gates, c12)

    # ---- Tail stage: layer-2 step T-1 only (the layer-1 half of the result is
    # a don't-care and is never read afterwards).
    gates = bias + jnp.dot(h12, w_rec, preferred_element_type=jnp.float32)
    h12, _ = dual_cell(gates, c12)

    # ---- Final Linear on h2_{T-1}.  fc-weight rows for the layer-1 half are
    # zero so h12 feeds the MXU directly (no lane-slice of the hidden state).
    w_fc2 = tail_ref[8:8 + H2, :]    # (2H, 8H)  only layer-2 rows / first O cols nonzero
    b_fc = tail_ref[1:2, :]          # (1, 8H)   only first O cols nonzero
    y = jnp.dot(h12, w_fc2, preferred_element_type=jnp.float32) + b_fc
    # TODO(synk): if OUTPUT_LEN grows, pad O to a multiple of 128 for an
    # unmasked lane-dense store; negligible at O=24.
    out_ref[...] = y[:B, :O].astype(out_ref.dtype)


# ----------------------------------------------------------------------------
# Wrappers
# ----------------------------------------------------------------------------
_VMEM = pl.BlockSpec(memory_space=pltpu.MemorySpace.VMEM)


def prepare_params(p):
    """One-time parameter packing (outside the per-call path).

    Produces 3 arrays in the gate-grouped layout the kernel consumes."""
    H = p["w_hh1"].shape[1]
    D = p["w_ih1"].shape[1]
    O = p["w_fc"].shape[0]

    wih1_t = jnp.transpose(p["w_ih1"])          # (D, 4H)
    whh1_t = jnp.transpose(p["w_hh1"])          # (H, 4H)
    wih2_t = jnp.transpose(p["w_ih2"])          # (H, 4H)
    whh2_t = jnp.transpose(p["w_hh2"])          # (H, 4H)
    b1 = (p["b_ih1"] + p["b_hh1"]).reshape(1, 4 * H)
    b2 = (p["b_ih2"] + p["b_hh2"]).reshape(1, 4 * H)

    def group(l1, l2):
        # PyTorch gate order i, f, g, o; interleave per-gate H-wide blocks so
        # columns become [i1 i2 | f1 f2 | g1 g2 | o1 o2].
        return jnp.concatenate(
            [blk for g in range(4)
             for blk in (l1[:, g * H:(g + 1) * H], l2[:, g * H:(g + 1) * H])],
            axis=1)

    zD = jnp.zeros((D, 4 * H), jnp.float32)
    zH = jnp.zeros((H, 4 * H), jnp.float32)
    w_in = group(wih1_t, zD)                                      # (D, 8H)
    w_rec = jnp.concatenate([group(whh1_t, wih2_t),               # h1 rows
                             group(zH, whh2_t)], axis=0)          # h2 rows -> (2H, 8H)
    bias_all = group(b1, b2)                                      # (1, 8H)

    tail = jnp.zeros((8 + 2 * H, 8 * H), jnp.float32)
    tail = tail.at[0, :].set(bias_all[0])
    tail = tail.at[1, :O].set(p["b_fc"])
    tail = tail.at[8 + H:8 + 2 * H, :O].set(jnp.transpose(p["w_fc"]))
    return {"w_in": w_in, "w_rec": w_rec, "tail": tail}


@functools.partial(jax.jit, static_argnames=("out_len",))
def lstm_model_forward(x, prepped, *, out_len):
    """x: (B, T, input_size) batch_first, like the PyTorch module (eval mode)."""
    B, T, D = x.shape
    bp = _BP * pl.cdiv(B, _BP)           # pad batch to whole sublane groups
    xp = jnp.pad(x, ((0, bp - B), (0, 0), (0, 0)))
    # Single tiny fused pad/transpose op ahead of the call.
    # TODO(synk): fold it into the call via CompilerParams(allow_input_fusion=[0])
    # once verified on the target toolchain.
    x_tm = jnp.transpose(xp, (1, 0, 2)).reshape(T * bp, D)
    kernel = functools.partial(fused_lstm_fc_kernel, seq_len=T)
    # Whole problem is < 200 KiB: keep everything VMEM-resident, no grid.
    # TODO(synk): for many independent sequences, add a leading batch grid with
    # dimension_semantics=("parallel",) so v7x shards across its 2 TensorCores,
    # and re-derive tile sizes against v7x's 64 MiB VMEM.
    return pl.pallas_call(
        kernel,
        out_shape=jax.ShapeDtypeStruct((B, out_len), jnp.float32),
        in_specs=[_VMEM] * 4,
        out_specs=_VMEM,
    )(x_tm, prepped["w_in"], prepped["w_rec"], prepped["tail"])


# ----------------------------------------------------------------------------
# Pure-JAX reference (for correctness check)
# ----------------------------------------------------------------------------
def ref_lstm_layer(x, w_ih, w_hh, b_ih, b_hh):
    B, T, _ = x.shape
    H = w_hh.shape[1]

    def step(carry, x_t):
        h, c = carry
        gates = x_t @ w_ih.T + h @ w_hh.T + b_ih + b_hh
        i_g = jax.nn.sigmoid(gates[:, 0 * H:1 * H])
        f_g = jax.nn.sigmoid(gates[:, 1 * H:2 * H])
        g_g = jnp.tanh(gates[:, 2 * H:3 * H])
        o_g = jax.nn.sigmoid(gates[:, 3 * H:4 * H])
        c = f_g * c + i_g * g_g
        h = o_g * jnp.tanh(c)
        return (h, c), h

    init = (jnp.zeros((B, H), jnp.float32), jnp.zeros((B, H), jnp.float32))
    _, hs = lax.scan(step, init, jnp.transpose(x, (1, 0, 2)))
    return jnp.transpose(hs, (1, 0, 2))


def ref_forward(x, p):
    out = ref_lstm_layer(x, p["w_ih1"], p["w_hh1"], p["b_ih1"], p["b_hh1"])
    out = ref_lstm_layer(out, p["w_ih2"], p["w_hh2"], p["b_ih2"], p["b_hh2"])
    last = out[:, -1, :]
    return last @ p["w_fc"].T + p["b_fc"]


# ----------------------------------------------------------------------------
# Main
# ----------------------------------------------------------------------------
if __name__ == "__main__":
    B, T = 2, 8
    INPUT_SIZE = 16
    HIDDEN = 32
    OUTPUT_LEN = 24

    key = jax.random.PRNGKey(0)
    keys = jax.random.split(key, 12)
    s = 1.0 / jnp.sqrt(HIDDEN)  # PyTorch LSTM/Linear default uniform bound

    def u(k, shape):
        return jax.random.uniform(k, shape, jnp.float32, -s, s)

    params = {
        # lstm1: input_size -> hidden
        "w_ih1": u(keys[0], (4 * HIDDEN, INPUT_SIZE)),
        "w_hh1": u(keys[1], (4 * HIDDEN, HIDDEN)),
        "b_ih1": u(keys[2], (4 * HIDDEN,)),
        "b_hh1": u(keys[3], (4 * HIDDEN,)),
        # lstm2: hidden -> hidden
        "w_ih2": u(keys[4], (4 * HIDDEN, HIDDEN)),
        "w_hh2": u(keys[5], (4 * HIDDEN, HIDDEN)),
        "b_ih2": u(keys[6], (4 * HIDDEN,)),
        "b_hh2": u(keys[7], (4 * HIDDEN,)),
        # fc: hidden -> output_len
        "w_fc": u(keys[8], (OUTPUT_LEN, HIDDEN)),
        "b_fc": u(keys[9], (OUTPUT_LEN,)),
    }

    x = jax.random.normal(keys[10], (B, T, INPUT_SIZE), jnp.float32)

    prepped = prepare_params(params)   # done once, outside the jitted forward
    out = lstm_model_forward(x, prepped, out_len=OUTPUT_LEN)
    out = jax.block_until_ready(out)
    assert out.shape == (B, OUTPUT_LEN), out.shape

    ref = ref_forward(x, params)
    err = float(jnp.max(jnp.abs(out - ref)))
    assert jnp.allclose(out, ref, atol=2e-5, rtol=1e-4), err

    print("KERNEL_OK")
</pallas_src>

<mosaic_0001>
module attributes {stable_mosaic.version = 11 : i64} {
  func.func @fused_lstm_fc_kernel(%arg0: memref<64x16xf32, #tpu.memory_space<vmem>>, %arg1: memref<16x256xf32, #tpu.memory_space<vmem>>, %arg2: memref<64x256xf32, #tpu.memory_space<vmem>>, %arg3: memref<72x256xf32, #tpu.memory_space<vmem>>, %arg4: memref<2x24xf32, #tpu.memory_space<vmem>>) attributes {dimension_semantics = [], scalar_prefetch = 0 : i64, scratch_operands = 0 : i64, tpu.core_type = #tpu.core_type<tc>} {
    %c0 = arith.constant 0 : index
    %c0_0 = arith.constant 0 : index
    %0 = vector.load %arg2[%c0, %c0_0] : memref<64x256xf32, #tpu.memory_space<vmem>>, vector<64x256xf32>
    %c0_1 = arith.constant 0 : index
    %c0_2 = arith.constant 0 : index
    %1 = vector.load %arg3[%c0_1, %c0_2] : memref<72x256xf32, #tpu.memory_space<vmem>>, vector<1x256xf32>
    %c0_3 = arith.constant 0 : index
    %c0_4 = arith.constant 0 : index
    %2 = vector.load %arg0[%c0_3, %c0_4] : memref<64x16xf32, #tpu.memory_space<vmem>>, vector<64x16xf32>
    %c0_5 = arith.constant 0 : index
    %c0_6 = arith.constant 0 : index
    %3 = vector.load %arg1[%c0_5, %c0_6] : memref<16x256xf32, #tpu.memory_space<vmem>>, vector<16x256xf32>
    %cst = arith.constant dense<0.000000e+00> : vector<64x256xf32>
    %4 = tpu.matmul %2, %3, %cst {dimension_numbers = #tpu.dot_dimension_numbers<[1], [0], [0], [1], [0, 0, 1, 1], [], []>} : vector<64x16xf32>, vector<16x256xf32>, vector<64x256xf32> -> vector<64x256xf32>
    %5 = vector.broadcast %1 : vector<1x256xf32> to vector<64x256xf32>
    %6 = arith.addf %4, %5 : vector<64x256xf32>
    %7 = tpu.iota {dimensions = array<i32: 1>} : vector<8x64xi32>
    %c32_i32 = arith.constant 32 : i32
    %8 = vector.broadcast %c32_i32 : i32 to vector<8x64xi32>
    %9 = arith.cmpi slt, %7, %8 : vector<8x64xi32>
    %10 = vector.extract_strided_slice %6 {offsets = [0, 0], sizes = [8, 256], strides = [1, 1]} : vector<64x256xf32> to vector<8x256xf32>
    %cst_7 = arith.constant 0.000000e+00 : f32
    %11 = vector.broadcast %cst_7 : f32 to vector<8x64xf32>
    %12 = arith.negf %10 : vector<8x256xf32>
    %13 = math.exp %12 : vector<8x256xf32>
    %cst_8 = arith.constant 1.000000e+00 : f32
    %14 = vector.broadcast %cst_8 : f32 to vector<8x256xf32>
    %15 = arith.addf %14, %13 : vector<8x256xf32>
    %16 = arith.divf %14, %15 : vector<8x256xf32>
    %17 = math.tanh %10 : vector<8x256xf32>
    %18 = vector.extract_strided_slice %16 {offsets = [0, 0], sizes = [8, 64], strides = [1, 1]} : vector<8x256xf32> to vector<8x64xf32>
    %19 = vector.extract_strided_slice %16 {offsets = [0, 64], sizes = [8, 64], strides = [1, 1]} : vector<8x256xf32> to vector<8x64xf32>
    %20 = vector.extract_strided_slice %17 {offsets = [0, 128], sizes = [8, 64], strides = [1, 1]} : vector<8x256xf32> to vector<8x64xf32>
    %21 = vector.extract_strided_slice %16 {offsets = [0, 192], sizes = [8, 64], strides = [1, 1]} : vector<8x256xf32> to vector<8x64xf32>
    %22 = arith.mulf %19, %11 : vector<8x64xf32>
    %23 = arith.mulf %18, %20 : vector<8x64xf32>
    %24 = arith.addf %22, %23 : vector<8x64xf32>
    %25 = math.tanh %24 : vector<8x64xf32>
    %26 = arith.mulf %21, %25 : vector<8x64xf32>
    %cst_9 = arith.constant 0.000000e+00 : f32
    %27 = vector.broadcast %cst_9 : f32 to vector<8x64xf32>
    %28 = arith.select %9, %26, %27 : vector<8x64xi1>, vector<8x64xf32>
    %cst_10 = arith.constant 0.000000e+00 : f32
    %29 = vector.broadcast %cst_10 : f32 to vector<8x64xf32>
    %30 = arith.select %9, %24, %29 : vector<8x64xi1>, vector<8x64xf32>
    %31 = vector.extract_strided_slice %6 {offsets = [8, 0], sizes = [8, 256], strides = [1, 1]} : vector<64x256xf32> to vector<8x256xf32>
    %cst_11 = arith.constant dense<0.000000e+00> : vector<8x256xf32>
    %32 = tpu.matmul %28, %0, %cst_11 {dimension_numbers = #tpu.dot_dimension_numbers<[1], [0], [0], [1], [0, 0, 1, 1], [], []>} : vector<8x64xf32>, vector<64x256xf32>, vector<8x256xf32> -> vector<8x256xf32>
    %33 = arith.addf %31, %32 : vector<8x256xf32>
    %34 = arith.negf %33 : vector<8x256xf32>
    %35 = math.exp %34 : vector<8x256xf32>
    %cst_12 = arith.constant 1.000000e+00 : f32
    %36 = vector.broadcast %cst_12 : f32 to vector<8x256xf32>
    %37 = arith.addf %36, %35 : vector<8x256xf32>
    %38 = arith.divf %36, %37 : vector<8x256xf32>
    %39 = math.tanh %33 : vector<8x256xf32>
    %40 = vector.extract_strided_slice %38 {offsets = [0, 0], sizes = [8, 64], strides = [1, 1]} : vector<8x256xf32> to vector<8x64xf32>
    %41 = vector.extract_strided_slice %38 {offsets = [0, 64], sizes = [8, 64], strides = [1, 1]} : vector<8x256xf32> to vector<8x64xf32>
    %42 = vector.extract_strided_slice %39 {offsets = [0, 128], sizes = [8, 64], strides = [1, 1]} : vector<8x256xf32> to vector<8x64xf32>
    %43 = vector.extract_strided_slice %38 {offsets = [0, 192], sizes = [8, 64], strides = [1, 1]} : vector<8x256xf32> to vector<8x64xf32>
    %44 = arith.mulf %41, %30 : vector<8x64xf32>
    %45 = arith.mulf %40, %42 : vector<8x64xf32>
    %46 = arith.addf %44, %45 : vector<8x64xf32>
    %47 = math.tanh %46 : vector<8x64xf32>
    %48 = arith.mulf %43, %47 : vector<8x64xf32>
    %49 = vector.extract_strided_slice %6 {offsets = [16, 0], sizes = [8, 256], strides = [1, 1]} : vector<64x256xf32> to vector<8x256xf32>
    %cst_13 = arith.constant dense<0.000000e+00> : vector<8x256xf32>
    %50 = tpu.matmul %48, %0, %cst_13 {dimension_numbers = #tpu.dot_dimension_numbers<[1], [0], [0], [1], [0, 0, 1, 1], [], []>} : vector<8x64xf32>, vector<64x256xf32>, vector<8x256xf32> -> vector<8x256xf32>
    %51 = arith.addf %49, %50 : vector<8x256xf32>
    %52 = arith.negf %51 : vector<8x256xf32>
    %53 = math.exp %52 : vector<8x256xf32>
    %cst_14 = arith.constant 1.000000e+00 : f32
    %54 = vector.broadcast %cst_14 : f32 to vector<8x256xf32>
    %55 = arith.addf %54, %53 : vector<8x256xf32>
    %56 = arith.divf %54, %55 : vector<8x256xf32>
    %57 = math.tanh %51 : vector<8x256xf32>
    %58 = vector.extract_strided_slice %56 {offsets = [0, 0], sizes = [8, 64], strides = [1, 1]} : vector<8x256xf32> to vector<8x64xf32>
    %59 = vector.extract_strided_slice %56 {offsets = [0, 64], sizes = [8, 64], strides = [1, 1]} : vector<8x256xf32> to vector<8x64xf32>
    %60 = vector.extract_strided_slice %57 {offsets = [0, 128], sizes = [8, 64], strides = [1, 1]} : vector<8x256xf32> to vector<8x64xf32>
    %61 = vector.extract_strided_slice %56 {offsets = [0, 192], sizes = [8, 64], strides = [1, 1]} : vector<8x256xf32> to vector<8x64xf32>
    %62 = arith.mulf %59, %46 : vector<8x64xf32>
    %63 = arith.mulf %58, %60 : vector<8x64xf32>
    %64 = arith.addf %62, %63 : vector<8x64xf32>
    %65 = math.tanh %64 : vector<8x64xf32>
    %66 = arith.mulf %61, %65 : vector<8x64xf32>
    %67 = vector.extract_strided_slice %6 {offsets = [24, 0], sizes = [8, 256], strides = [1, 1]} : vector<64x256xf32> to vector<8x256xf32>
    %cst_15 = arith.constant dense<0.000000e+00> : vector<8x256xf32>
    %68 = tpu.matmul %66, %0, %cst_15 {dimension_numbers = #tpu.dot_dimension_numbers<[1], [0], [0], [1], [0, 0, 1, 1], [], []>} : vector<8x64xf32>, vector<64x256xf32>, vector<8x256xf32> -> vector<8x256xf32>
    %69 = arith.addf %67, %68 : vector<8x256xf32>
    %70 = arith.negf %69 : vector<8x256xf32>
    %71 = math.exp %70 : vector<8x256xf32>
    %cst_16 = arith.constant 1.000000e+00 : f32
    %72 = vector.broadcast %cst_16 : f32 to vector<8x256xf32>
    %73 = arith.addf %72, %71 : vector<8x256xf32>
    %74 = arith.divf %72, %73 : vector<8x256xf32>
    %75 = math.tanh %69 : vector<8x256xf32>
    %76 = vector.extract_strided_slice %74 {offsets = [0, 0], sizes = [8, 64], strides = [1, 1]} : vector<8x256xf32> to vector<8x64xf32>
    %77 = vector.extract_strided_slice %74 {offsets = [0, 64], sizes = [8, 64], strides = [1, 1]} : vector<8x256xf32> to vector<8x64xf32>
    %78 = vector.extract_strided_slice %75 {offsets = [0, 128], sizes = [8, 64], strides = [1, 1]} : vector<8x256xf32> to vector<8x64xf32>
    %79 = vector.extract_strided_slice %74 {offsets = [0, 192], sizes = [8, 64], strides = [1, 1]} : vector<8x256xf32> to vector<8x64xf32>
    %80 = arith.mulf %77, %64 : vector<8x64xf32>
    %81 = arith.mulf %76, %78 : vector<8x64xf32>
    %82 = arith.addf %80, %81 : vector<8x64xf32>
    %83 = math.tanh %82 : vector<8x64xf32>
    %84 = arith.mulf %79, %83 : vector<8x64xf32>
    %85 = vector.extract_strided_slice %6 {offsets = [32, 0], sizes = [8, 256], strides = [1, 1]} : vector<64x256xf32> to vector<8x256xf32>
    %cst_17 = arith.constant dense<0.000000e+00> : vector<8x256xf32>
    %86 = tpu.matmul %84, %0, %cst_17 {dimension_numbers = #tpu.dot_dimension_numbers<[1], [0], [0], [1], [0, 0, 1, 1], [], []>} : vector<8x64xf32>, vector<64x256xf32>, vector<8x256xf32> -> vector<8x256xf32>
    %87 = arith.addf %85, %86 : vector<8x256xf32>
    %88 = arith.negf %87 : vector<8x256xf32>
    %89 = math.exp %88 : vector<8x256xf32>
    %cst_18 = arith.constant 1.000000e+00 : f32
    %90 = vector.broadcast %cst_18 : f32 to vector<8x256xf32>
    %91 = arith.addf %90, %89 : vector<8x256xf32>
    %92 = arith.divf %90, %91 : vector<8x256xf32>
    %93 = math.tanh %87 : vector<8x256xf32>
    %94 = vector.extract_strided_slice %92 {offsets = [0, 0], sizes = [8, 64], strides = [1, 1]} : vector<8x256xf32> to vector<8x64xf32>
    %95 = vector.extract_strided_slice %92 {offsets = [0, 64], sizes = [8, 64], strides = [1, 1]} : vector<8x256xf32> to vector<8x64xf32>
    %96 = vector.extract_strided_slice %93 {offsets = [0, 128], sizes = [8, 64], strides = [1, 1]} : vector<8x256xf32> to vector<8x64xf32>
    %97 = vector.extract_strided_slice %92 {offsets = [0, 192], sizes = [8, 64], strides = [1, 1]} : vector<8x256xf32> to vector<8x64xf32>
    %98 = arith.mulf %95, %82 : vector<8x64xf32>
    %99 = arith.mulf %94, %96 : vector<8x64xf32>
    %100 = arith.addf %98, %99 : vector<8x64xf32>
    %101 = math.tanh %100 : vector<8x64xf32>
    %102 = arith.mulf %97, %101 : vector<8x64xf32>
    %103 = vector.extract_strided_slice %6 {offsets = [40, 0], sizes = [8, 256], strides = [1, 1]} : vector<64x256xf32> to vector<8x256xf32>
    %cst_19 = arith.constant dense<0.000000e+00> : vector<8x256xf32>
    %104 = tpu.matmul %102, %0, %cst_19 {dimension_numbers = #tpu.dot_dimension_numbers<[1], [0], [0], [1], [0, 0, 1, 1], [], []>} : vector<8x64xf32>, vector<64x256xf32>, vector<8x256xf32> -> vector<8x256xf32>
    %105 = arith.addf %103, %104 : vector<8x256xf32>
    %106 = arith.negf %105 : vector<8x256xf32>
    %107 = math.exp %106 : vector<8x256xf32>
    %cst_20 = arith.constant 1.000000e+00 : f32
    %108 = vector.broadcast %cst_20 : f32 to vector<8x256xf32>
    %109 = arith.addf %108, %107 : vector<8x256xf32>
    %110 = arith.divf %108, %109 : vector<8x256xf32>
    %111 = math.tanh %105 : vector<8x256xf32>
    %112 = vector.extract_strided_slice %110 {offsets = [0, 0], sizes = [8, 64], strides = [1, 1]} : vector<8x256xf32> to vector<8x64xf32>
    %113 = vector.extract_strided_slice %110 {offsets = [0, 64], sizes = [8, 64], strides = [1, 1]} : vector<8x256xf32> to vector<8x64xf32>
    %114 = vector.extract_strided_slice %111 {offsets = [0, 128], sizes = [8, 64], strides = [1, 1]} : vector<8x256xf32> to vector<8x64xf32>
    %115 = vector.extract_strided_slice %110 {offsets = [0, 192], sizes = [8, 64], strides = [1, 1]} : vector<8x256xf32> to vector<8x64xf32>
    %116 = arith.mulf %113, %100 : vector<8x64xf32>
    %117 = arith.mulf %112, %114 : vector<8x64xf32>
    %118 = arith.addf %116, %117 : vector<8x64xf32>
    %119 = math.tanh %118 : vector<8x64xf32>
    %120 = arith.mulf %115, %119 : vector<8x64xf32>
    %121 = vector.extract_strided_slice %6 {offsets = [48, 0], sizes = [8, 256], strides = [1, 1]} : vector<64x256xf32> to vector<8x256xf32>
    %cst_21 = arith.constant dense<0.000000e+00> : vector<8x256xf32>
    %122 = tpu.matmul %120, %0, %cst_21 {dimension_numbers = #tpu.dot_dimension_numbers<[1], [0], [0], [1], [0, 0, 1, 1], [], []>} : vector<8x64xf32>, vector<64x256xf32>, vector<8x256xf32> -> vector<8x256xf32>
    %123 = arith.addf %121, %122 : vector<8x256xf32>
    %124 = arith.negf %123 : vector<8x256xf32>
    %125 = math.exp %124 : vector<8x256xf32>
    %cst_22 = arith.constant 1.000000e+00 : f32
    %126 = vector.broadcast %cst_22 : f32 to vector<8x256xf32>
    %127 = arith.addf %126, %125 : vector<8x256xf32>
    %128 = arith.divf %126, %127 : vector<8x256xf32>
    %129 = math.tanh %123 : vector<8x256xf32>
    %130 = vector.extract_strided_slice %128 {offsets = [0, 0], sizes = [8, 64], strides = [1, 1]} : vector<8x256xf32> to vector<8x64xf32>
    %131 = vector.extract_strided_slice %128 {offsets = [0, 64], sizes = [8, 64], strides = [1, 1]} : vector<8x256xf32> to vector<8x64xf32>
    %132 = vector.extract_strided_slice %129 {offsets = [0, 128], sizes = [8, 64], strides = [1, 1]} : vector<8x256xf32> to vector<8x64xf32>
    %133 = vector.extract_strided_slice %128 {offsets = [0, 192], sizes = [8, 64], strides = [1, 1]} : vector<8x256xf32> to vector<8x64xf32>
    %134 = arith.mulf %131, %118 : vector<8x64xf32>
    %135 = arith.mulf %130, %132 : vector<8x64xf32>
    %136 = arith.addf %134, %135 : vector<8x64xf32>
    %137 = math.tanh %136 : vector<8x64xf32>
    %138 = arith.mulf %133, %137 : vector<8x64xf32>
    %139 = vector.extract_strided_slice %6 {offsets = [56, 0], sizes = [8, 256], strides = [1, 1]} : vector<64x256xf32> to vector<8x256xf32>
    %cst_23 = arith.constant dense<0.000000e+00> : vector<8x256xf32>
    %140 = tpu.matmul %138, %0, %cst_23 {dimension_numbers = #tpu.dot_dimension_numbers<[1], [0], [0], [1], [0, 0, 1, 1], [], []>} : vector<8x64xf32>, vector<64x256xf32>, vector<8x256xf32> -> vector<8x256xf32>
    %141 = arith.addf %139, %140 : vector<8x256xf32>
    %142 = arith.negf %141 : vector<8x256xf32>
    %143 = math.exp %142 : vector<8x256xf32>
    %cst_24 = arith.constant 1.000000e+00 : f32
    %144 = vector.broadcast %cst_24 : f32 to vector<8x256xf32>
    %145 = arith.addf %144, %143 : vector<8x256xf32>
    %146 = arith.divf %144, %145 : vector<8x256xf32>
    %147 = math.tanh %141 : vector<8x256xf32>
    %148 = vector.extract_strided_slice %146 {offsets = [0, 0], sizes = [8, 64], strides = [1, 1]} : vector<8x256xf32> to vector<8x64xf32>
    %149 = vector.extract_strided_slice %146 {offsets = [0, 64], sizes = [8, 64], strides = [1, 1]} : vector<8x256xf32> to vector<8x64xf32>
    %150 = vector.extract_strided_slice %147 {offsets = [0, 128], sizes = [8, 64], strides = [1, 1]} : vector<8x256xf32> to vector<8x64xf32>
    %151 = vector.extract_strided_slice %146 {offsets = [0, 192], sizes = [8, 64], strides = [1, 1]} : vector<8x256xf32> to vector<8x64xf32>
    %152 = arith.mulf %149, %136 : vector<8x64xf32>
    %153 = arith.mulf %148, %150 : vector<8x64xf32>
    %154 = arith.addf %152, %153 : vector<8x64xf32>
    %155 = math.tanh %154 : vector<8x64xf32>
    %156 = arith.mulf %151, %155 : vector<8x64xf32>
    %cst_25 = arith.constant dense<0.000000e+00> : vector<8x256xf32>
    %157 = tpu.matmul %156, %0, %cst_25 {dimension_numbers = #tpu.dot_dimension_numbers<[1], [0], [0], [1], [0, 0, 1, 1], [], []>} : vector<8x64xf32>, vector<64x256xf32>, vector<8x256xf32> -> vector<8x256xf32>
    %158 = vector.broadcast %1 : vector<1x256xf32> to vector<8x256xf32>
    %159 = arith.addf %158, %157 : vector<8x256xf32>
    %160 = arith.negf %159 : vector<8x256xf32>
    %161 = math.exp %160 : vector<8x256xf32>
    %cst_26 = arith.constant 1.000000e+00 : f32
    %162 = vector.broadcast %cst_26 : f32 to vector<8x256xf32>
    %163 = arith.addf %162, %161 : vector<8x256xf32>
    %164 = arith.divf %162, %163 : vector<8x256xf32>
    %165 = math.tanh %159 : vector<8x256xf32>
    %166 = vector.extract_strided_slice %164 {offsets = [0, 0], sizes = [8, 64], strides = [1, 1]} : vector<8x256xf32> to vector<8x64xf32>
    %167 = vector.extract_strided_slice %164 {offsets = [0, 64], sizes = [8, 64], strides = [1, 1]} : vector<8x256xf32> to vector<8x64xf32>
    %168 = vector.extract_strided_slice %165 {offsets = [0, 128], sizes = [8, 64], strides = [1, 1]} : vector<8x256xf32> to vector<8x64xf32>
    %169 = vector.extract_strided_slice %164 {offsets = [0, 192], sizes = [8, 64], strides = [1, 1]} : vector<8x256xf32> to vector<8x64xf32>
    %170 = arith.mulf %167, %154 : vector<8x64xf32>
    %171 = arith.mulf %166, %168 : vector<8x64xf32>
    %172 = arith.addf %170, %171 : vector<8x64xf32>
    %173 = math.tanh %172 : vector<8x64xf32>
    %174 = arith.mulf %169, %173 : vector<8x64xf32>
    %c8 = arith.constant 8 : index
    %c0_27 = arith.constant 0 : index
    %175 = vector.load %arg3[%c8, %c0_27] : memref<72x256xf32, #tpu.memory_space<vmem>>, vector<64x256xf32>
    %c1 = arith.constant 1 : index
    %c0_28 = arith.constant 0 : index
    %176 = vector.load %arg3[%c1, %c0_28] : memref<72x256xf32, #tpu.memory_space<vmem>>, vector<1x256xf32>
    %cst_29 = arith.constant dense<0.000000e+00> : vector<8x256xf32>
    %177 = tpu.matmul %174, %175, %cst_29 {dimension_numbers = #tpu.dot_dimension_numbers<[1], [0], [0], [1], [0, 0, 1, 1], [], []>} : vector<8x64xf32>, vector<64x256xf32>, vector<8x256xf32> -> vector<8x256xf32>
    %178 = vector.broadcast %176 : vector<1x256xf32> to vector<8x256xf32>
    %179 = arith.addf %177, %178 : vector<8x256xf32>
    %180 = vector.extract_strided_slice %179 {offsets = [0, 0], sizes = [2, 24], strides = [1, 1]} : vector<8x256xf32> to vector<2x24xf32>
    %c0_30 = arith.constant 0 : index
    %c0_31 = arith.constant 0 : index
    %181 = vector.load %arg4[%c0_30, %c0_31] : memref<2x24xf32, #tpu.memory_space<vmem>>, vector<2x24xf32>
    tpu.vector_store %arg4[%c0_30, %c0_31], %180 {strides = array<i32>} : memref<2x24xf32, #tpu.memory_space<vmem>>, vector<2x24xf32>,
    return
  }
}

</mosaic_0001>

<bundles_post_ra>
// kernel: lstm_model_forward.1
= control target key start
LH: loop header
LB: loop body
LE: loop exit
PB: predicated region body
PF: predicated region fallthrough
CT: control target
= control target key end

     0   :  { %9 = vsyncpa [#allocation3], 0  ;;  %s1638_s0 = inlined_call_operand.vmem [shape: f32[64,16], index: 0, kind: input, shape index: {}]   ;;  %s1639_s1 = inlined_call_operand.vmem [shape: f32[16,256], index: 1, kind: input, shape index: {}]   ;;  %s1640_s2 = inlined_call_operand.hbm [shape: f32[64,256], index: 2, kind: input, shape index: {}]   ;;  %s1641_s3 = inlined_call_operand.vmem [shape: f32[72,256], index: 3, kind: input, shape index: {}]   ;;  %s1642_s4 = inlined_call_operand.hbm [shape: f32[2,24], index: 4, kind: output, shape index: {}]  }
   0x1   :  { %10 = vsyncpa [#allocation4], 0  ;;  %s19_s17 = sshll.u32 %s1640_s2, 4  ;;  %s1273_s18 = smov [#allocation2]   ;;  %s20_s17 = int_to_ptr.hbm [resolvable:$true] %s19_s17 }
   0x2   :  { %s21_s19 = sshll.u32 %s1273_s18, 4  ;;  %s1274_s20 = smov 256   ;;  %s22_s19 = int_to_ptr.vmem [resolvable:$true] %s21_s19 }
   0x3   :  { %s1275_s21 = smov 16  }
   0x4   :  { %27 = dma.hbm_to_vmem [thread:$0]  %s20_s17, 2048, %s22_s19, [#allocation3], %s1274_s20, %s1274_s20, %s1275_s21  }
   0x5   :  { %1269 = dma.done.wait [#allocation3], 2048  }
   0x6   :  { %1270 = vsyncadd [#allocation3], 4294965248  ;;  %v61_v0 = vld [vmem:[%s1639_s1 + $0x10] sm:$0xff]  ;;  %v59_v1 = vld [vmem:[%s1639_s1] sm:$0xff]  ;;  %vm68_vm0 = vcmask 130048   ;;  %v175_v62 = vlaneseq  ;;  %vm236_vm10 = vcmask 523264  }
   0x7   :  { %107 = vmatpush.msra.mxu0 %v61_v0  ;;  %v51_v2 = vld [vmem:[%s1638_s0] sm:$0xff]  ;;  %v62_v3 = vld [vmem:[%s1639_s1 + $0x18] sm:$0xff]  ;;  %v60_v4 = vld [vmem:[%s1639_s1 + $0x8] sm:$0xff]  ;;  %s1276_s1 = smov 64   ;;  %s1277_s11 = smov [#allocation5]  }
   0x8   :  { %148 = vmatpush.msra.mxu1 %v62_v3  ;;  %v50_v5 = vld [vmem:[%s1641_s3] ss:$8 sm:$0x3]  ;;  %v1333_v30 = vld [vmem:[#allocation2 + $0x70] sm:$0xff]  ;;  %v1335_v31 = vld [vmem:[#allocation2 + $0x78] sm:$0xff]  ;;  %v176_v63 = vand.u32 127, %v175_v62 }
   0x9   :  { %108 = vmatpush.msra.mxu0 %v59_v1  ;;  %v1326_v6 = vperm.slane %v50_v5, 0  ;;  %v1329_v12 = vperm.slane %v50_v5, 1  ;;  %v1337_v32 = vld [vmem:[#allocation2 + $0x60] sm:$0xff]  ;;  %248 = vmatpush.msra.mxu2 %v1333_v30  ;;  %v1341_v33 = vld [vmem:[#allocation2 + $0x68] sm:$0xff]  ;;  %v1351_v49 = vld [vmem:[#allocation2 + $0x50] sm:$0xff]  ;;  %s1044_s12 = sshll.u32 %s1277_s11, 4  ;;  %s1045_s12 = int_to_ptr.vmem [resolvable:$true] %s1044_s12 }
   0xa   :  { %1056 = vmatmul.msk.f32.vlgmr.msra.gmra.mxu0 %vm68_vm0, %v51_v2  ;;  %149 = vmatpush.msra.mxu1 %v60_v4  ;;  %v1353_v50 = vld [vmem:[#allocation2 + $0x58] sm:$0xff]  ;;  %v1357_v51 = vld [vmem:[#allocation2 + $0x40] sm:$0xff]  ;;  %v1359_v52 = vld [vmem:[#allocation2 + $0x48] sm:$0xff]  ;;  %vm177_vm9 = vcmp.lt.s32.totalorder %v176_v63, 32  ;;  %s1046_s15 = sshll.u32 %s1642_s4, 4  ;;  %s1047_s15 = int_to_ptr.hbm [resolvable:$true] %s1046_s15 }
   0xb   :  { %1064 = vmatmul.msk.f32.vlgmr.msra.gmra.mxu1 %vm68_vm0, %v51_v2  ;;  %268 = vmatpush.msra.mxu3 %v1335_v31  ;;  %v1365_v53 = vld [vmem:[#allocation2 + $0x30] sm:$0xff]  ;;  %v1367_v54 = vld [vmem:[#allocation2 + $0x38] sm:$0xff]  ;;  %v1369_v55 = vld [vmem:[#allocation2 + $0x20] sm:$0xff] }
   0xc   :  { %632 = vmatpush.msrb.mxu0 %v1333_v30  ;;  %652 = vmatpush.msrb.mxu1 %v1335_v31  ;;  %v1371_v56 = vld [vmem:[#allocation2 + $0x28] sm:$0xff]  ;;  %v1377_v57 = vld [vmem:[#allocation2 + $0x10] sm:$0xff]  ;;  %v1379_v58 = vld [vmem:[#allocation2 + $0x18] sm:$0xff] }
   0xd   :  { %249 = vmatpush.msra.mxu2 %v1337_v32  ;;  %269 = vmatpush.msra.mxu3 %v1341_v33  ;;  %v1389_v59 = vld [vmem:[#allocation2] sm:$0xff]  ;;  %v1391_v60 = vld [vmem:[#allocation2 + $0x8] sm:$0xff] }
   0xe   :  { %633 = vmatpush.msrb.mxu0 %v1337_v32  ;;  %653 = vmatpush.msrb.mxu1 %v1341_v33  ;;  %v52_v61 = vld [vmem:[%s1638_s0 + $0x8] sm:$0xff] }
   0xf   :  { %250 = vmatpush.msra.mxu2 %v1351_v49  ;;  %270 = vmatpush.msra.mxu3 %v1353_v50 }
  0x10   :  { %634 = vmatpush.msrb.mxu0 %v1351_v49  ;;  %654 = vmatpush.msrb.mxu1 %v1353_v50 }
  0x11   :  { %251 = vmatpush.msra.mxu2 %v1357_v51  ;;  %271 = vmatpush.msra.mxu3 %v1359_v52 }
  0x12   :  { %635 = vmatpush.msrb.mxu0 %v1357_v51  ;;  %655 = vmatpush.msrb.mxu1 %v1359_v52 }
  0x13   :  { %252 = vmatpush.msra.mxu2 %v1365_v53  ;;  %272 = vmatpush.msra.mxu3 %v1367_v54 }
  0x14   :  { %636 = vmatpush.msrb.mxu0 %v1365_v53  ;;  %656 = vmatpush.msrb.mxu1 %v1367_v54 }
  0x15   :  { %253 = vmatpush.msra.mxu2 %v1369_v55  ;;  %273 = vmatpush.msra.mxu3 %v1371_v56 }
  0x16   :  { %637 = vmatpush.msrb.mxu0 %v1369_v55  ;;  %657 = vmatpush.msrb.mxu1 %v1371_v56 }
  0x17   :  { %254 = vmatpush.msra.mxu2 %v1377_v57  ;;  %274 = vmatpush.msra.mxu3 %v1379_v58 }
  0x18   :  { %638 = vmatpush.msrb.mxu0 %v1377_v57  ;;  %658 = vmatpush.msrb.mxu1 %v1379_v58 }
  0x19   :  { %255 = vmatpush.msra.mxu2 %v1389_v59  ;;  %275 = vmatpush.msra.mxu3 %v1391_v60 }
  0x1a   :  { %1057 = vmatmul.msk.f32.gmra.mxu0 %vm68_vm0, %v52_v61  ;;  %1065 = vmatmul.msk.f32.gmra.mxu1 %vm68_vm0, %v52_v61 }
  0x1b   :  { %347 = vmatpush.msrb.mxu2 %v1333_v30  ;;  %367 = vmatpush.msrb.mxu3 %v1335_v31 }
  0x1c   :  { %639 = vmatpush.msrb.mxu0 %v1389_v59  ;;  %659 = vmatpush.msrb.mxu1 %v1391_v60 }
  0x1d   :  { %348 = vmatpush.msrb.mxu2 %v1337_v32  ;;  %368 = vmatpush.msrb.mxu3 %v1341_v33 }
  0x1e   :  { %822 = vmatpush.msra.mxu0 %v1333_v30  ;;  %842 = vmatpush.msra.mxu1 %v1335_v31 }
  0x1f   :  { %349 = vmatpush.msrb.mxu2 %v1351_v49  ;;  %369 = vmatpush.msrb.mxu3 %v1353_v50 }
  0x20   :  { %823 = vmatpush.msra.mxu0 %v1337_v32  ;;  %843 = vmatpush.msra.mxu1 %v1341_v33 }
  0x21   :  { %350 = vmatpush.msrb.mxu2 %v1357_v51  ;;  %370 = vmatpush.msrb.mxu3 %v1359_v52 }
  0x22   :  { %824 = vmatpush.msra.mxu0 %v1351_v49  ;;  %844 = vmatpush.msra.mxu1 %v1353_v50 }
  0x23   :  { %351 = vmatpush.msrb.mxu2 %v1365_v53  ;;  %371 = vmatpush.msrb.mxu3 %v1367_v54 }
  0x24   :  { %825 = vmatpush.msra.mxu0 %v1357_v51  ;;  %845 = vmatpush.msra.mxu1 %v1359_v52 }
  0x25   :  { %352 = vmatpush.msrb.mxu2 %v1369_v55  ;;  %372 = vmatpush.msrb.mxu3 %v1371_v56 }
  0x26   :  { %826 = vmatpush.msra.mxu0 %v1365_v53  ;;  %846 = vmatpush.msra.mxu1 %v1367_v54 }
  0x27   :  { %353 = vmatpush.msrb.mxu2 %v1377_v57  ;;  %373 = vmatpush.msrb.mxu3 %v1379_v58 }
  0x28   :  { %827 = vmatpush.msra.mxu0 %v1369_v55  ;;  %847 = vmatpush.msra.mxu1 %v1371_v56 }
  0x29   :  { %354 = vmatpush.msrb.mxu2 %v1389_v59  ;;  %374 = vmatpush.msrb.mxu3 %v1391_v60 }
  0x2a   :  { %828 = vmatpush.msra.mxu0 %v1377_v57  ;;  %848 = vmatpush.msra.mxu1 %v1379_v58 }
  0x2c   :  { %829 = vmatpush.msra.mxu0 %v1389_v59  ;;  %849 = vmatpush.msra.mxu1 %v1391_v60 }
  0x87   :  { %v110_v7 = vpop.f32.mrf.mxu0 }
  0x88   :  { %v111_v8 = vadd.f32 %v110_v7, %v1326_v6  ;;  %v151_v13 = vpop.f32.mrf.mxu1 }
  0x89   :  { %v152_v15 = vadd.f32 %v151_v13, %v1329_v12 }
  0x8a   :  { %v1072_v9 = vmul.f32 -1.442695, %v111_v8 }
  0x8b   :  { %v1073_v27 = vmul.f32 -1.442695, %v152_v15 }
  0x8c   :  { %1113 = vpow2.f32 %v1072_v9 }
  0x92   :  { %v1114_v10 = vpop.eup %1113 }
  0x93   :  { %v184_v11 = vadd.f32 1.0, %v1114_v10 }
  0x95   :  { %1115 = vrcp.f32 %v184_v11  ;;  %v197_v18 = vand.u32 2147483648, %v184_v11  ;;  %v195_v20 = vand.u32 2147483647, %v184_v11  ;;  %vm191_vm2 = vweird.f32 %v184_v11 }
  0x96   :  { %1117 = vtanh.f32 %v152_v15 }
  0x97   :  { %v198_v23 = vor.u32 1.1754944e-38, %v197_v18  ;;  %vm196_vm4 = vcmp.eq.f32.partialorder %v195_v20, 8.507059e+37  ;;  %1119 = vpow2.f32 %v1073_v27  ;;  %v113_v4 = vpop.f32.mrf.mxu0  ;;  %v154_v13 = vpop.f32.mrf.mxu1 }
  0x98   :  { %v114_v5 = vadd.f32 %v113_v4, %v1326_v6 }
  0x9b   :  { %v1116_v14 = vpop.eup %1115 }
  0x9c   :  { %v187_v16 = vmul.f32 %v1116_v14, %v184_v11  ;;  %vm192_vm1 = vweird.f32 %v1116_v14  ;;  %v1118_v22 = vpop.eup %1117 }
  0x9d   :  { %vm193_vm3 = vmor %vm191_vm2, %vm192_vm1  ;;  %v1120_v28 = vpop.eup %1119 }
  0x9e   :  { %v188_v17 = vsub.f32 1.0, %v187_v16  ;;  %v185_v29 = vadd.f32 1.0, %v1120_v28 }
  0xa0   :  { %v189_v19 = vmul.f32 %v1116_v14, %v188_v17  ;;  %1121 = vrcp.f32 %v185_v29  ;;  %vm206_vm5 = vweird.f32 %v185_v29  ;;  %v212_v41 = vand.u32 2147483648, %v185_v29 }
  0xa1   :  { %v210_v43 = vand.u32 2147483647, %v185_v29 }
  0xa2   :  { %v190_v21 = vadd.f32 %v1116_v14, %v189_v19  ;;  %v213_v44 = vor.u32 1.1754944e-38, %v212_v41 }
  0xa3   :  { %vm211_vm8 = vcmp.eq.f32.partialorder %v210_v43, 8.507059e+37 }
  0xa4   :  { %v194_v24 = vsel %vm193_vm3, %v1116_v14, %v190_v21  ;;  %v155_v14 = vadd.f32 %v154_v13, %v1329_v12 }
  0xa5   :  { %v199_v25 = vsel %vm196_vm4, %v198_v23, %v194_v24 }
  0xa6   :  { %v218_v26 = vmul.f32 %v1118_v22, %v199_v25  ;;  %v1122_v34 = vpop.eup %1121  ;;  %v217_v38 = vmul.f32 0.0, %v199_v25 }
  0xa7   :  { %v202_v35 = vmul.f32 %v1122_v34, %v185_v29  ;;  %vm207_vm6 = vweird.f32 %v1122_v34 }
  0xa8   :  { %220 = vrot.lane.b32.xlu0 %v218_v26, %s1276_s1  ;;  %vm208_vm7 = vmor %vm206_vm5, %vm207_vm6 }
  0xa9   :  { %v203_v36 = vsub.f32 1.0, %v202_v35 }
  0xab   :  { %v204_v37 = vmul.f32 %v1122_v34, %v203_v36 }
  0xad   :  { %v205_v42 = vadd.f32 %v1122_v34, %v204_v37 }
  0xaf   :  { %v209_v45 = vsel %vm208_vm7, %v1122_v34, %v205_v42 }
  0xb0   :  { %v214_v47 = vsel %vm211_vm8, %v213_v44, %v209_v45 }
 0x11a   :  { %v221_v39 = vpop.permute.xlu0 %220 }
 0x11b   :  { %v223_v40 = vadd.f32 %v221_v39, %v217_v38 }
 0x11d   :  { %1123 = vtanh.f32 %v223_v40  ;;  %232 = vrot.lane.b32.xlu1 %v223_v40, %s1276_s1 }
 0x123   :  { %v1124_v46 = vpop.eup %1123 }
 0x124   :  { %v225_v48 = vmul.f32 %v1124_v46, %v214_v47 }
 0x126   :  { %227 = vrot.lane.b32.xlu0 %v225_v48, %s1276_s1 }
 0x18f   :  { %v233_v0 = vpop.permute.xlu1 %232 }
 0x190   :  { %v235_v1 = vsel %vm177_vm9, %v233_v0, 0.0  ;;  %v53_v0 = vld [vmem:[%s1638_s0 + $0x10] sm:$0xff] }
 0x191   :  { %322 = vrot.lane.b32.xlu1 %v235_v1, %s1276_s1  ;;  %1058 = vmatmul.msk.f32.gmra.mxu0 %vm68_vm0, %v53_v0 }
 0x192   :  { %1066 = vmatmul.msk.f32.gmra.mxu1 %vm68_vm0, %v53_v0 }
 0x198   :  { %v228_v2 = vpop.permute.xlu0 %227 }
 0x199   :  { %v230_v3 = vsel %vm177_vm9, %v228_v2, 0.0 }
 0x19a   :  { %1074 = vmatmul.msk.f32.vlgmr.msra.gmra.mxu2 %vm236_vm10, %v230_v3  ;;  %1075 = vmatmul.msk.f32.vlgmr.msra.gmra.mxu3 %vm236_vm10, %v230_v3 }
 0x19b   :  { %442 = vmatpush.msra.mxu2 %v1333_v30  ;;  %462 = vmatpush.msra.mxu3 %v1335_v31 }
 0x19d   :  { %443 = vmatpush.msra.mxu2 %v1337_v32  ;;  %463 = vmatpush.msra.mxu3 %v1341_v33 }
 0x19f   :  { %444 = vmatpush.msra.mxu2 %v1351_v49  ;;  %464 = vmatpush.msra.mxu3 %v1353_v50 }
 0x1a1   :  { %445 = vmatpush.msra.mxu2 %v1357_v51  ;;  %465 = vmatpush.msra.mxu3 %v1359_v52 }
 0x1a3   :  { %446 = vmatpush.msra.mxu2 %v1365_v53  ;;  %466 = vmatpush.msra.mxu3 %v1367_v54 }
 0x1a5   :  { %447 = vmatpush.msra.mxu2 %v1369_v55  ;;  %467 = vmatpush.msra.mxu3 %v1371_v56 }
 0x1a7   :  { %448 = vmatpush.msra.mxu2 %v1377_v57  ;;  %468 = vmatpush.msra.mxu3 %v1379_v58 }
 0x1a9   :  { %449 = vmatpush.msra.mxu2 %v1389_v59  ;;  %469 = vmatpush.msra.mxu3 %v1391_v60 }
 0x203   :  { %v323_v39 = vpop.permute.xlu1 %322 }
 0x20e   :  { %v116_v2 = vpop.f32.mrf.mxu0 }
 0x20f   :  { %v117_v3 = vadd.f32 %v116_v2, %v1326_v6 }
 0x21d   :  { %v257_v7 = vpop.f32.mrf.mxu2  ;;  %v277_v15 = vpop.f32.mrf.mxu3 }
 0x21e   :  { %v280_v8 = vadd.f32 %v257_v7, %v114_v5  ;;  %v281_v17 = vadd.f32 %v277_v15, %v155_v14 }
 0x220   :  { %v1076_v9 = vmul.f32 -1.442695, %v280_v8  ;;  %v1077_v29 = vmul.f32 -1.442695, %v281_v17 }
 0x222   :  { %1125 = vpow2.f32 %v1076_v9 }
 0x228   :  { %v1126_v10 = vpop.eup %1125 }
 0x229   :  { %v288_v11 = vadd.f32 1.0, %v1126_v10  ;;  %v157_v10 = vpop.f32.mrf.mxu1 }
 0x22b   :  { %1127 = vrcp.f32 %v288_v11  ;;  %v301_v20 = vand.u32 2147483648, %v288_v11  ;;  %v299_v22 = vand.u32 2147483647, %v288_v11  ;;  %vm295_vm12 = vweird.f32 %v288_v11 }
 0x22c   :  { %1129 = vtanh.f32 %v281_v17 }
 0x22d   :  { %v302_v24 = vor.u32 1.1754944e-38, %v301_v20  ;;  %vm300_vm14 = vcmp.eq.f32.partialorder %v299_v22, 8.507059e+37  ;;  %1131 = vpow2.f32 %v1077_v29 }
 0x231   :  { %v1128_v16 = vpop.eup %1127 }
 0x232   :  { %v291_v18 = vmul.f32 %v1128_v16, %v288_v11  ;;  %vm296_vm11 = vweird.f32 %v1128_v16  ;;  %v1130_v26 = vpop.eup %1129  ;;  %v158_v11 = vadd.f32 %v157_v10, %v1329_v12 }
 0x233   :  { %vm297_vm13 = vmor %vm295_vm12, %vm296_vm11  ;;  %v1132_v34 = vpop.eup %1131 }
 0x234   :  { %v292_v19 = vsub.f32 1.0, %v291_v18  ;;  %v289_v35 = vadd.f32 1.0, %v1132_v34 }
 0x236   :  { %v293_v21 = vmul.f32 %v1128_v16, %v292_v19  ;;  %1133 = vrcp.f32 %v289_v35  ;;  %v316_v45 = vand.u32 2147483648, %v289_v35  ;;  %vm310_vm1 = vweird.f32 %v289_v35 }
 0x237   :  { %v314_v46 = vand.u32 2147483647, %v289_v35 }
 0x238   :  { %v294_v23 = vadd.f32 %v1128_v16, %v293_v21  ;;  %v317_v48 = vor.u32 1.1754944e-38, %v316_v45 }
 0x239   :  { %vm315_vm3 = vcmp.eq.f32.partialorder %v314_v46, 8.507059e+37 }
 0x23a   :  { %v298_v25 = vsel %vm297_vm13, %v1128_v16, %v294_v23 }
 0x23b   :  { %v303_v27 = vsel %vm300_vm14, %v302_v24, %v298_v25 }
 0x23c   :  { %v326_v28 = vmul.f32 %v1130_v26, %v303_v27  ;;  %v1134_v36 = vpop.eup %1133  ;;  %v325_v41 = vmul.f32 %v323_v39, %v303_v27 }
 0x23d   :  { %v306_v37 = vmul.f32 %v1134_v36, %v289_v35  ;;  %vm311_vm15 = vweird.f32 %v1134_v36 }
 0x23e   :  { %328 = vrot.lane.b32.xlu2 %v326_v28, %s1276_s1  ;;  %vm312_vm2 = vmor %vm310_vm1, %vm311_vm15 }
 0x23f   :  { %v307_v38 = vsub.f32 1.0, %v306_v37 }
 0x241   :  { %v308_v40 = vmul.f32 %v1134_v36, %v307_v38 }
 0x243   :  { %v309_v44 = vadd.f32 %v1134_v36, %v308_v40 }
 0x245   :  { %v313_v47 = vsel %vm312_vm2, %v1134_v36, %v309_v44 }
 0x246   :  { %v318_v62 = vsel %vm315_vm3, %v317_v48, %v313_v47 }
 0x298   :  { %v329_v42 = vpop.permute.xlu2 %328 }
 0x299   :  { %v1458_v43 = vadd.f32 %v329_v42, %v325_v41 }
 0x29b   :  { %1135 = vtanh.f32 %v1458_v43 }
 0x2a1   :  { %v1136_v61 = vpop.eup %1135 }
 0x2a2   :  { %v333_v63 = vmul.f32 %v1136_v61, %v318_v62 }
 0x2a4   :  { %335 = vrot.lane.b32.xlu2 %v333_v63, %s1276_s1 }
 0x2fe   :  { %v336_v1 = vpop.permute.xlu2 %335 }
 0x2ff   :  { %1078 = vmatmul.msk.f32.vlgmr.msrb.gmra.mxu2 %vm236_vm10, %v336_v1  ;;  %1079 = vmatmul.msk.f32.vlgmr.msrb.gmra.mxu3 %vm236_vm10, %v336_v1 }
 0x300   :  { %537 = vmatpush.msrb.mxu2 %v1333_v30  ;;  %557 = vmatpush.msrb.mxu3 %v1335_v31 }
 0x302   :  { %538 = vmatpush.msrb.mxu2 %v1337_v32  ;;  %558 = vmatpush.msrb.mxu3 %v1341_v33 }
 0x304   :  { %539 = vmatpush.msrb.mxu2 %v1351_v49  ;;  %559 = vmatpush.msrb.mxu3 %v1353_v50 }
 0x306   :  { %540 = vmatpush.msrb.mxu2 %v1357_v51  ;;  %560 = vmatpush.msrb.mxu3 %v1359_v52 }
 0x308   :  { %541 = vmatpush.msrb.mxu2 %v1365_v53  ;;  %561 = vmatpush.msrb.mxu3 %v1367_v54 }
 0x30a   :  { %542 = vmatpush.msrb.mxu2 %v1369_v55  ;;  %562 = vmatpush.msrb.mxu3 %v1371_v56 }
 0x30c   :  { %543 = vmatpush.msrb.mxu2 %v1377_v57  ;;  %563 = vmatpush.msrb.mxu3 %v1379_v58 }
 0x30e   :  { %544 = vmatpush.msrb.mxu2 %v1389_v59  ;;  %564 = vmatpush.msrb.mxu3 %v1391_v60 }
 0x382   :  { %v356_v4 = vpop.f32.mrf.mxu2  ;;  %v376_v13 = vpop.f32.mrf.mxu3 }
 0x383   :  { %v379_v5 = vadd.f32 %v356_v4, %v117_v3  ;;  %v380_v15 = vadd.f32 %v376_v13, %v158_v11 }
 0x385   :  { %v1080_v7 = vmul.f32 -1.442695, %v379_v5  ;;  %v1081_v27 = vmul.f32 -1.442695, %v380_v15 }
 0x387   :  { %1137 = vpow2.f32 %v1080_v7 }
 0x38d   :  { %v1138_v8 = vpop.eup %1137 }
 0x38e   :  { %v387_v9 = vadd.f32 1.0, %v1138_v8 }
 0x390   :  { %1139 = vrcp.f32 %v387_v9  ;;  %v400_v18 = vand.u32 2147483648, %v387_v9  ;;  %v398_v20 = vand.u32 2147483647, %v387_v9  ;;  %vm394_vm5 = vweird.f32 %v387_v9 }
 0x391   :  { %1141 = vtanh.f32 %v380_v15 }
 0x392   :  { %v401_v22 = vor.u32 1.1754944e-38, %v400_v18  ;;  %vm399_vm7 = vcmp.eq.f32.partialorder %v398_v20, 8.507059e+37  ;;  %1143 = vpow2.f32 %v1081_v27 }
 0x396   :  { %v1140_v14 = vpop.eup %1139 }
 0x397   :  { %v390_v16 = vmul.f32 %v1140_v14, %v387_v9  ;;  %vm395_vm4 = vweird.f32 %v1140_v14  ;;  %v1142_v24 = vpop.eup %1141 }
 0x398   :  { %vm396_vm6 = vmor %vm394_vm5, %vm395_vm4  ;;  %v1144_v28 = vpop.eup %1143 }
 0x399   :  { %v391_v17 = vsub.f32 1.0, %v390_v16  ;;  %v388_v29 = vadd.f32 1.0, %v1144_v28 }
 0x39b   :  { %v392_v19 = vmul.f32 %v1140_v14, %v391_v17  ;;  %1145 = vrcp.f32 %v388_v29  ;;  %v415_v42 = vand.u32 2147483648, %v388_v29  ;;  %vm409_vm9 = vweird.f32 %v388_v29 }
 0x39c   :  { %v413_v44 = vand.u32 2147483647, %v388_v29 }
 0x39d   :  { %v393_v21 = vadd.f32 %v1140_v14, %v392_v19  ;;  %v416_v46 = vor.u32 1.1754944e-38, %v415_v42 }
 0x39e   :  { %vm414_vm12 = vcmp.eq.f32.partialorder %v413_v44, 8.507059e+37 }
 0x39f   :  { %v397_v23 = vsel %vm396_vm6, %v1140_v14, %v393_v21 }
 0x3a0   :  { %v402_v25 = vsel %vm399_vm7, %v401_v22, %v397_v23 }
 0x3a1   :  { %v421_v26 = vmul.f32 %v1142_v24, %v402_v25  ;;  %v1146_v34 = vpop.eup %1145  ;;  %v420_v38 = vmul.f32 %v402_v25, %v1458_v43  ;;  %v54_v43 = vld [vmem:[%s1638_s0 + $0x18] sm:$0xff] }
 0x3a2   :  { %v405_v35 = vmul.f32 %v1146_v34, %v388_v29  ;;  %vm410_vm8 = vweird.f32 %v1146_v34  ;;  %1059 = vmatmul.msk.f32.gmra.mxu0 %vm68_vm0, %v54_v43  ;;  %1067 = vmatmul.msk.f32.gmra.mxu1 %vm68_vm0, %v54_v43 }
 0x3a3   :  { %423 = vrot.lane.b32.xlu0 %v421_v26, %s1276_s1  ;;  %vm411_vm11 = vmor %vm409_vm9, %vm410_vm8 }
 0x3a4   :  { %v406_v36 = vsub.f32 1.0, %v405_v35 }
 0x3a6   :  { %v407_v37 = vmul.f32 %v1146_v34, %v406_v36 }
 0x3a8   :  { %v408_v41 = vadd.f32 %v1146_v34, %v407_v37 }
 0x3aa   :  { %v412_v45 = vsel %vm411_vm11, %v1146_v34, %v408_v41 }
 0x3ab   :  { %v417_v48 = vsel %vm414_vm12, %v416_v46, %v412_v45 }
 0x415   :  { %v424_v39 = vpop.permute.xlu0 %423 }
 0x416   :  { %v1489_v40 = vadd.f32 %v424_v39, %v420_v38 }
 0x418   :  { %1147 = vtanh.f32 %v1489_v40 }
 0x41e   :  { %v1148_v47 = vpop.eup %1147 }
 0x41f   :  { %v428_v61 = vmul.f32 %v1148_v47, %v417_v48  ;;  %v119_v63 = vpop.f32.mrf.mxu0  ;;  %v160_v7 = vpop.f32.mrf.mxu1 }
 0x420   :  { %v120_v0 = vadd.f32 %v119_v63, %v1326_v6  ;;  %v161_v8 = vadd.f32 %v160_v7, %v1329_v12  ;;  %v56_v7 = vld [vmem:[%s1638_s0 + $0x28] sm:$0xff] }
 0x421   :  { %430 = vrot.lane.b32.xlu1 %v428_v61, %s1276_s1 }
 0x493   :  { %v431_v62 = vpop.permute.xlu1 %430 }
 0x494   :  { %1082 = vmatmul.msk.f32.vlgmr.msra.gmra.mxu2 %vm236_vm10, %v431_v62  ;;  %1083 = vmatmul.msk.f32.vlgmr.msra.gmra.mxu3 %vm236_vm10, %v431_v62 }
 0x495   :  { %727 = vmatpush.msra.mxu2 %v1333_v30  ;;  %747 = vmatpush.msra.mxu3 %v1335_v31 }
 0x497   :  { %728 = vmatpush.msra.mxu2 %v1337_v32  ;;  %748 = vmatpush.msra.mxu3 %v1341_v33 }
 0x499   :  { %729 = vmatpush.msra.mxu2 %v1351_v49  ;;  %749 = vmatpush.msra.mxu3 %v1353_v50 }
 0x49b   :  { %730 = vmatpush.msra.mxu2 %v1357_v51  ;;  %750 = vmatpush.msra.mxu3 %v1359_v52 }
 0x49d   :  { %731 = vmatpush.msra.mxu2 %v1365_v53  ;;  %751 = vmatpush.msra.mxu3 %v1367_v54 }
 0x49f   :  { %732 = vmatpush.msra.mxu2 %v1369_v55  ;;  %752 = vmatpush.msra.mxu3 %v1371_v56 }
 0x4a1   :  { %733 = vmatpush.msra.mxu2 %v1377_v57  ;;  %753 = vmatpush.msra.mxu3 %v1379_v58 }
 0x4a3   :  { %734 = vmatpush.msra.mxu2 %v1389_v59  ;;  %754 = vmatpush.msra.mxu3 %v1391_v60 }
 0x517   :  { %v451_v1 = vpop.f32.mrf.mxu2  ;;  %v471_v9 = vpop.f32.mrf.mxu3 }
 0x518   :  { %v474_v2 = vadd.f32 %v451_v1, %v120_v0  ;;  %v475_v11 = vadd.f32 %v471_v9, %v161_v8  ;;  %v57_v8 = vld [vmem:[%s1638_s0 + $0x30] sm:$0xff] }
 0x51a   :  { %v1084_v3 = vmul.f32 -1.442695, %v474_v2  ;;  %v1085_v24 = vmul.f32 -1.442695, %v475_v11 }
 0x51c   :  { %1149 = vpow2.f32 %v1084_v3 }
 0x522   :  { %v1150_v4 = vpop.eup %1149 }
 0x523   :  { %v482_v5 = vadd.f32 1.0, %v1150_v4 }
 0x525   :  { %1151 = vrcp.f32 %v482_v5  ;;  %v495_v15 = vand.u32 2147483648, %v482_v5  ;;  %v493_v17 = vand.u32 2147483647, %v482_v5  ;;  %vm489_vm14 = vweird.f32 %v482_v5 }
 0x526   :  { %1153 = vtanh.f32 %v475_v11 }
 0x527   :  { %v496_v19 = vor.u32 1.1754944e-38, %v495_v15  ;;  %vm494_vm1 = vcmp.eq.f32.partialorder %v493_v17, 8.507059e+37  ;;  %1155 = vpow2.f32 %v1085_v24 }
 0x52b   :  { %v1152_v10 = vpop.eup %1151 }
 0x52c   :  { %v485_v13 = vmul.f32 %v1152_v10, %v482_v5  ;;  %vm490_vm13 = vweird.f32 %v1152_v10  ;;  %v1154_v21 = vpop.eup %1153 }
 0x52d   :  { %vm491_vm15 = vmor %vm489_vm14, %vm490_vm13  ;;  %v1156_v25 = vpop.eup %1155 }
 0x52e   :  { %v486_v14 = vsub.f32 1.0, %v485_v13  ;;  %v483_v26 = vadd.f32 1.0, %v1156_v25  ;;  %v58_v13 = vld [vmem:[%s1638_s0 + $0x38] sm:$0xff] }
 0x530   :  { %v487_v16 = vmul.f32 %v1152_v10, %v486_v14  ;;  %1157 = vrcp.f32 %v483_v26  ;;  %v510_v39 = vand.u32 2147483648, %v483_v26  ;;  %vm504_vm3 = vweird.f32 %v483_v26 }
 0x531   :  { %v508_v41 = vand.u32 2147483647, %v483_v26 }
 0x532   :  { %v488_v18 = vadd.f32 %v1152_v10, %v487_v16  ;;  %v511_v44 = vor.u32 1.1754944e-38, %v510_v39 }
 0x533   :  { %vm509_vm5 = vcmp.eq.f32.partialorder %v508_v41, 8.507059e+37 }
 0x534   :  { %v492_v20 = vsel %vm491_vm15, %v1152_v10, %v488_v18 }
 0x535   :  { %v497_v22 = vsel %vm494_vm1, %v496_v19, %v492_v20 }
 0x536   :  { %v516_v23 = vmul.f32 %v1154_v21, %v497_v22  ;;  %v1158_v27 = vpop.eup %1157  ;;  %v515_v35 = vmul.f32 %v497_v22, %v1489_v40  ;;  %v55_v40 = vld [vmem:[%s1638_s0 + $0x20] sm:$0xff] }
 0x537   :  { %v500_v28 = vmul.f32 %v1158_v27, %v483_v26  ;;  %vm505_vm2 = vweird.f32 %v1158_v27  ;;  %1060 = vmatmul.msk.f32.gmra.mxu0 %vm68_vm0, %v55_v40  ;;  %1068 = vmatmul.msk.f32.gmra.mxu1 %vm68_vm0, %v55_v40 }
 0x538   :  { %518 = vrot.lane.b32.xlu2 %v516_v23, %s1276_s1  ;;  %vm506_vm4 = vmor %vm504_vm3, %vm505_vm2 }
 0x539   :  { %v501_v29 = vsub.f32 1.0, %v500_v28 }
 0x53b   :  { %v502_v34 = vmul.f32 %v1158_v27, %v501_v29 }
 0x53d   :  { %v503_v38 = vadd.f32 %v1158_v27, %v502_v34 }
 0x53f   :  { %v507_v42 = vsel %vm506_vm4, %v1158_v27, %v503_v38  ;;  %1061 = vmatmul.msk.f32.gmra.mxu0 %vm68_vm0, %v56_v7  ;;  %1069 = vmatmul.msk.f32.gmra.mxu1 %vm68_vm0, %v56_v7 }
 0x540   :  { %v512_v46 = vsel %vm509_vm5, %v511_v44, %v507_v42 }
 0x547   :  { %1062 = vmatmul.msk.f32.gmra.mxu0 %vm68_vm0, %v57_v8  ;;  %1070 = vmatmul.msk.f32.gmra.mxu1 %vm68_vm0, %v57_v8 }
 0x54f   :  { %1063 = vmatmul.msk.f32.gmra.mxu0 %vm68_vm0, %v58_v13  ;;  %1071 = vmatmul.msk.f32.gmra.mxu1 %vm68_vm0, %v58_v13 }
 0x592   :  { %v519_v36 = vpop.permute.xlu2 %518 }
 0x593   :  { %v1520_v37 = vadd.f32 %v519_v36, %v515_v35 }
 0x595   :  { %1159 = vtanh.f32 %v1520_v37 }
 0x59b   :  { %v1160_v45 = vpop.eup %1159 }
 0x59c   :  { %v523_v47 = vmul.f32 %v1160_v45, %v512_v46 }
 0x59e   :  { %525 = vrot.lane.b32.xlu0 %v523_v47, %s1276_s1 }
 0x610   :  { %v526_v48 = vpop.permute.xlu0 %525 }
 0x611   :  { %1086 = vmatmul.msk.f32.vlgmr.msrb.gmra.mxu2 %vm236_vm10, %v526_v48  ;;  %1087 = vmatmul.msk.f32.vlgmr.msrb.gmra.mxu3 %vm236_vm10, %v526_v48 }
 0x612   :  { %917 = vmatpush.msrb.mxu2 %v1333_v30  ;;  %937 = vmatpush.msrb.mxu3 %v1335_v31  ;;  %v122_v30 = vpop.f32.mrf.mxu0 }
 0x613   :  { %v123_v31 = vadd.f32 %v122_v30, %v1326_v6 }
 0x614   :  { %918 = vmatpush.msrb.mxu2 %v1337_v32  ;;  %938 = vmatpush.msrb.mxu3 %v1341_v33 }
 0x616   :  { %919 = vmatpush.msrb.mxu2 %v1351_v49  ;;  %939 = vmatpush.msrb.mxu3 %v1353_v50 }
 0x618   :  { %920 = vmatpush.msrb.mxu2 %v1357_v51  ;;  %940 = vmatpush.msrb.mxu3 %v1359_v52  ;;  %v163_v52 = vpop.f32.mrf.mxu1 }
 0x61a   :  { %921 = vmatpush.msrb.mxu2 %v1365_v53  ;;  %941 = vmatpush.msrb.mxu3 %v1367_v54  ;;  %v164_v53 = vadd.f32 %v163_v52, %v1329_v12  ;;  %v125_v27 = vpop.f32.mrf.mxu0 }
 0x61b   :  { %v126_v36 = vadd.f32 %v125_v27, %v1326_v6 }
 0x61c   :  { %922 = vmatpush.msrb.mxu2 %v1369_v55  ;;  %942 = vmatpush.msrb.mxu3 %v1371_v56 }
 0x61e   :  { %923 = vmatpush.msrb.mxu2 %v1377_v57  ;;  %943 = vmatpush.msrb.mxu3 %v1379_v58 }
 0x620   :  { %924 = vmatpush.msrb.mxu2 %v1389_v59  ;;  %944 = vmatpush.msrb.mxu3 %v1391_v60  ;;  %v166_v29 = vpop.f32.mrf.mxu1 }
 0x621   :  { %v167_v45 = vadd.f32 %v166_v29, %v1329_v12 }
 0x622   :  { %v1569_v28 = vpop.f32.mrf.mxu0 }
 0x628   :  { %v1573_v35 = vpop.f32.mrf.mxu1 }
 0x62a   :  { %v1571_v34 = vpop.f32.mrf.mxu0 }
 0x630   :  { %v1576_v41 = vpop.f32.mrf.mxu1 }
 0x694   :  { %v546_v32 = vpop.f32.mrf.mxu2  ;;  %v566_v54 = vpop.f32.mrf.mxu3 }
 0x695   :  { %v569_v33 = vadd.f32 %v546_v32, %v123_v31  ;;  %v570_v56 = vadd.f32 %v566_v54, %v164_v53 }
 0x697   :  { %v1088_v49 = vmul.f32 -1.442695, %v569_v33  ;;  %v1089_v3 = vmul.f32 -1.442695, %v570_v56 }
 0x699   :  { %1161 = vpow2.f32 %v1088_v49 }
 0x69f   :  { %v1162_v50 = vpop.eup %1161 }
 0x6a0   :  { %v577_v51 = vadd.f32 1.0, %v1162_v50 }
 0x6a2   :  { %1163 = vrcp.f32 %v577_v51  ;;  %v590_v59 = vand.u32 2147483648, %v577_v51  ;;  %v588_v61 = vand.u32 2147483647, %v577_v51  ;;  %vm584_vm7 = vweird.f32 %v577_v51 }
 0x6a3   :  { %1165 = vtanh.f32 %v570_v56 }
 0x6a4   :  { %v591_v62 = vor.u32 1.1754944e-38, %v590_v59  ;;  %vm589_vm9 = vcmp.eq.f32.partialorder %v588_v61, 8.507059e+37  ;;  %1167 = vpow2.f32 %v1089_v3 }
 0x6a8   :  { %v1164_v55 = vpop.eup %1163 }
 0x6a9   :  { %v580_v57 = vmul.f32 %v1164_v55, %v577_v51  ;;  %vm585_vm6 = vweird.f32 %v1164_v55  ;;  %v1166_v0 = vpop.eup %1165 }
 0x6aa   :  { %vm586_vm8 = vmor %vm584_vm7, %vm585_vm6  ;;  %v1168_v4 = vpop.eup %1167 }
 0x6ab   :  { %v581_v58 = vsub.f32 1.0, %v580_v57  ;;  %v578_v5 = vadd.f32 1.0, %v1168_v4 }
 0x6ad   :  { %v582_v60 = vmul.f32 %v1164_v55, %v581_v58  ;;  %1169 = vrcp.f32 %v578_v5  ;;  %v605_v19 = vand.u32 2147483648, %v578_v5  ;;  %vm599_vm12 = vweird.f32 %v578_v5 }
 0x6ae   :  { %v603_v20 = vand.u32 2147483647, %v578_v5 }
 0x6af   :  { %v583_v43 = vadd.f32 %v1164_v55, %v582_v60  ;;  %v606_v22 = vor.u32 1.1754944e-38, %v605_v19 }
 0x6b0   :  { %vm604_vm14 = vcmp.eq.f32.partialorder %v603_v20, 8.507059e+37 }
 0x6b1   :  { %v587_v63 = vsel %vm586_vm8, %v1164_v55, %v583_v43 }
 0x6b2   :  { %v592_v1 = vsel %vm589_vm9, %v591_v62, %v587_v63 }
 0x6b3   :  { %v611_v2 = vmul.f32 %v1166_v0, %v592_v1  ;;  %v1170_v9 = vpop.eup %1169  ;;  %v610_v15 = vmul.f32 %v592_v1, %v1520_v37 }
 0x6b4   :  { %v595_v10 = vmul.f32 %v1170_v9, %v578_v5  ;;  %vm600_vm11 = vweird.f32 %v1170_v9 }
 0x6b5   :  { %613 = vrot.lane.b32.xlu1 %v611_v2, %s1276_s1  ;;  %vm601_vm13 = vmor %vm599_vm12, %vm600_vm11 }
 0x6b6   :  { %v596_v11 = vsub.f32 1.0, %v595_v10  ;;  %v129_v10 = vadd.f32 %v1569_v28, %v1326_v6 }
 0x6b8   :  { %v597_v14 = vmul.f32 %v1170_v9, %v596_v11 }
 0x6ba   :  { %v598_v18 = vadd.f32 %v1170_v9, %v597_v14 }
 0x6bc   :  { %v602_v21 = vsel %vm601_vm13, %v1170_v9, %v598_v18  ;;  %v170_v18 = vadd.f32 %v1573_v35, %v1329_v12 }
 0x6bd   :  { %v607_v24 = vsel %vm604_vm14, %v606_v22, %v602_v21 }
 0x727   :  { %v614_v16 = vpop.permute.xlu1 %613 }
 0x728   :  { %v616_v17 = vadd.f32 %v614_v16, %v610_v15 }
 0x72a   :  { %1171 = vtanh.f32 %v616_v17 }
 0x730   :  { %v1172_v23 = vpop.eup %1171 }
 0x731   :  { %v618_v25 = vmul.f32 %v1172_v23, %v607_v24 }
 0x733   :  { %620 = vrot.lane.b32.xlu2 %v618_v25, %s1276_s1 }
 0x78d   :  { %v621_v26 = vpop.permute.xlu2 %620 }
 0x78e   :  { %1090 = vmatmul.msk.f32.vlgmr.msrb.gmra.mxu0 %vm236_vm10, %v621_v26  ;;  %1091 = vmatmul.msk.f32.vlgmr.msrb.gmra.mxu1 %vm236_vm10, %v621_v26 }
 0x80b   :  { %v641_v37 = vpop.f32.mrf.mxu0  ;;  %v661_v46 = vpop.f32.mrf.mxu1 }
 0x80c   :  { %v664_v38 = vadd.f32 %v641_v37, %v126_v36  ;;  %v665_v40 = vadd.f32 %v661_v46, %v167_v45 }
 0x80e   :  { %v1092_v39 = vmul.f32 -1.442695, %v664_v38  ;;  %v1093_v55 = vmul.f32 -1.442695, %v665_v40 }
 0x810   :  { %1173 = vpow2.f32 %v1092_v39 }
 0x816   :  { %v1174_v42 = vpop.eup %1173 }
 0x817   :  { %v672_v44 = vadd.f32 1.0, %v1174_v42 }
 0x819   :  { %1175 = vrcp.f32 %v672_v44  ;;  %v685_v31 = vand.u32 2147483648, %v672_v44  ;;  %v683_v33 = vand.u32 2147483647, %v672_v44  ;;  %vm679_vm15 = vweird.f32 %v672_v44 }
 0x81a   :  { %1177 = vtanh.f32 %v665_v40 }
 0x81b   :  { %v686_v50 = vor.u32 1.1754944e-38, %v685_v31  ;;  %vm684_vm2 = vcmp.eq.f32.partialorder %v683_v33, 8.507059e+37  ;;  %1179 = vpow2.f32 %v1093_v55 }
 0x81f   :  { %v1176_v47 = vpop.eup %1175 }
 0x820   :  { %v675_v48 = vmul.f32 %v1176_v47, %v672_v44  ;;  %vm680_vm0 = vweird.f32 %v1176_v47  ;;  %v1178_v52 = vpop.eup %1177 }
 0x821   :  { %vm681_vm1 = vmor %vm679_vm15, %vm680_vm0  ;;  %v1180_v56 = vpop.eup %1179 }
 0x822   :  { %v676_v30 = vsub.f32 1.0, %v675_v48  ;;  %v673_v57 = vadd.f32 1.0, %v1180_v56 }
 0x824   :  { %v677_v32 = vmul.f32 %v1176_v47, %v676_v30  ;;  %1181 = vrcp.f32 %v673_v57  ;;  %v700_v1 = vand.u32 2147483648, %v673_v57  ;;  %vm694_vm4 = vweird.f32 %v673_v57 }
 0x825   :  { %v698_v2 = vand.u32 2147483647, %v673_v57 }
 0x826   :  { %v678_v49 = vadd.f32 %v1176_v47, %v677_v32  ;;  %v701_v4 = vor.u32 1.1754944e-38, %v700_v1 }
 0x827   :  { %vm699_vm6 = vcmp.eq.f32.partialorder %v698_v2, 8.507059e+37 }
 0x828   :  { %v682_v51 = vsel %vm681_vm1, %v1176_v47, %v678_v49 }
 0x829   :  { %v687_v53 = vsel %vm684_vm2, %v686_v50, %v682_v51 }
 0x82a   :  { %v706_v54 = vmul.f32 %v1178_v52, %v687_v53  ;;  %v1182_v58 = vpop.eup %1181  ;;  %v705_v43 = vmul.f32 %v687_v53, %v616_v17 }
 0x82b   :  { %v690_v59 = vmul.f32 %v1182_v58, %v673_v57  ;;  %vm695_vm3 = vweird.f32 %v1182_v58 }
 0x82c   :  { %708 = vrot.lane.b32.xlu0 %v706_v54, %s1276_s1  ;;  %vm696_vm5 = vmor %vm694_vm4, %vm695_vm3  ;;  %v132_v54 = vadd.f32 %v1571_v34, %v1326_v6 }
 0x82d   :  { %v691_v60 = vsub.f32 1.0, %v690_v59 }
 0x82f   :  { %v692_v61 = vmul.f32 %v1182_v58, %v691_v60 }
 0x831   :  { %v693_v0 = vadd.f32 %v1182_v58, %v692_v61  ;;  %v173_v61 = vadd.f32 %v1576_v41, %v1329_v12 }
 0x833   :  { %v697_v3 = vsel %vm696_vm5, %v1182_v58, %v693_v0 }
 0x834   :  { %v702_v7 = vsel %vm699_vm6, %v701_v4, %v697_v3 }
 0x89e   :  { %v709_v62 = vpop.permute.xlu0 %708 }
 0x89f   :  { %v711_v63 = vadd.f32 %v709_v62, %v705_v43 }
 0x8a1   :  { %1183 = vtanh.f32 %v711_v63 }
 0x8a7   :  { %v1184_v5 = vpop.eup %1183 }
 0x8a8   :  { %v713_v8 = vmul.f32 %v1184_v5, %v702_v7 }
 0x8aa   :  { %715 = vrot.lane.b32.xlu1 %v713_v8, %s1276_s1 }
 0x91c   :  { %v716_v9 = vpop.permute.xlu1 %715 }
 0x91d   :  { %1094 = vmatmul.msk.f32.vlgmr.msra.gmra.mxu2 %vm236_vm10, %v716_v9  ;;  %1095 = vmatmul.msk.f32.vlgmr.msra.gmra.mxu3 %vm236_vm10, %v716_v9 }
 0x9a0   :  { %v736_v11 = vpop.f32.mrf.mxu2  ;;  %v756_v17 = vpop.f32.mrf.mxu3 }
 0x9a1   :  { %v759_v13 = vadd.f32 %v736_v11, %v129_v10  ;;  %v760_v20 = vadd.f32 %v756_v17, %v170_v18 }
 0x9a3   :  { %v1096_v14 = vmul.f32 -1.442695, %v759_v13  ;;  %v1097_v35 = vmul.f32 -1.442695, %v760_v20 }
 0x9a5   :  { %1185 = vpow2.f32 %v1096_v14 }
 0x9ab   :  { %v1186_v15 = vpop.eup %1185 }
 0x9ac   :  { %v767_v16 = vadd.f32 1.0, %v1186_v15 }
 0x9ae   :  { %1187 = vrcp.f32 %v767_v16  ;;  %v780_v23 = vand.u32 2147483648, %v767_v16  ;;  %v778_v25 = vand.u32 2147483647, %v767_v16  ;;  %vm774_vm8 = vweird.f32 %v767_v16 }
 0x9af   :  { %1189 = vtanh.f32 %v760_v20 }
 0x9b0   :  { %v781_v27 = vor.u32 1.1754944e-38, %v780_v23  ;;  %vm779_vm11 = vcmp.eq.f32.partialorder %v778_v25, 8.507059e+37  ;;  %1191 = vpow2.f32 %v1097_v35 }
 0x9b4   :  { %v1188_v19 = vpop.eup %1187 }
 0x9b5   :  { %v770_v21 = vmul.f32 %v1188_v19, %v767_v16  ;;  %vm775_vm7 = vweird.f32 %v1188_v19  ;;  %v1190_v29 = vpop.eup %1189 }
 0x9b6   :  { %vm776_vm9 = vmor %vm774_vm8, %vm775_vm7  ;;  %v1192_v38 = vpop.eup %1191 }
 0x9b7   :  { %v771_v22 = vsub.f32 1.0, %v770_v21  ;;  %v768_v39 = vadd.f32 1.0, %v1192_v38 }
 0x9b9   :  { %v772_v24 = vmul.f32 %v1188_v19, %v771_v22  ;;  %1193 = vrcp.f32 %v768_v39  ;;  %v795_v31 = vand.u32 2147483648, %v768_v39  ;;  %vm789_vm13 = vweird.f32 %v768_v39 }
 0x9ba   :  { %v793_v32 = vand.u32 2147483647, %v768_v39 }
 0x9bb   :  { %v773_v26 = vadd.f32 %v1188_v19, %v772_v24  ;;  %v796_v49 = vor.u32 1.1754944e-38, %v795_v31 }
 0x9bc   :  { %vm794_vm0 = vcmp.eq.f32.partialorder %v793_v32, 8.507059e+37 }
 0x9bd   :  { %v777_v28 = vsel %vm776_vm9, %v1188_v19, %v773_v26 }
 0x9be   :  { %v782_v36 = vsel %vm779_vm11, %v781_v27, %v777_v28 }
 0x9bf   :  { %v801_v37 = vmul.f32 %v1190_v29, %v782_v36  ;;  %v1194_v42 = vpop.eup %1193  ;;  %v800_v47 = vmul.f32 %v782_v36, %v711_v63 }
 0x9c0   :  { %v785_v44 = vmul.f32 %v1194_v42, %v768_v39  ;;  %vm790_vm12 = vweird.f32 %v1194_v42 }
 0x9c1   :  { %803 = vrot.lane.b32.xlu2 %v801_v37, %s1276_s1  ;;  %vm791_vm14 = vmor %vm789_vm13, %vm790_vm12 }
 0x9c2   :  { %v786_v45 = vsub.f32 1.0, %v785_v44 }
 0x9c4   :  { %v787_v46 = vmul.f32 %v1194_v42, %v786_v45 }
 0x9c6   :  { %v788_v30 = vadd.f32 %v1194_v42, %v787_v46 }
 0x9c8   :  { %v792_v33 = vsel %vm791_vm14, %v1194_v42, %v788_v30 }
 0x9c9   :  { %v797_v51 = vsel %vm794_vm0, %v796_v49, %v792_v33 }
 0xa1b   :  { %v804_v40 = vpop.permute.xlu2 %803 }
 0xa1c   :  { %v806_v48 = vadd.f32 %v804_v40, %v800_v47 }
 0xa1e   :  { %1195 = vtanh.f32 %v806_v48 }
 0xa24   :  { %v1196_v50 = vpop.eup %1195 }
 0xa25   :  { %v808_v52 = vmul.f32 %v1196_v50, %v797_v51 }
 0xa27   :  { %810 = vrot.lane.b32.xlu0 %v808_v52, %s1276_s1  ;;  %v1006_v52 = vld [vmem:[%s1641_s3 + $0x80] sm:$0xff] }
 0xa28   :  { %1025 = vmatpush.msrb.mxu0 %v1006_v52 }
 0xa99   :  { %v811_v53 = vpop.permute.xlu0 %810 }
 0xa9a   :  { %1098 = vmatmul.msk.f32.vlgmr.msra.gmra.mxu0 %vm236_vm10, %v811_v53  ;;  %1099 = vmatmul.msk.f32.vlgmr.msra.gmra.mxu1 %vm236_vm10, %v811_v53  ;;  %v1005_v53 = vld [vmem:[%s1641_s3 + $0x70] sm:$0xff] }
 0xa9b   :  { %1026 = vmatpush.msrb.mxu0 %v1005_v53 }
 0xb17   :  { %v831_v55 = vpop.f32.mrf.mxu0  ;;  %v851_v60 = vpop.f32.mrf.mxu1 }
 0xb18   :  { %v854_v56 = vadd.f32 %v831_v55, %v132_v54  ;;  %v855_v62 = vadd.f32 %v851_v60, %v173_v61  ;;  %v1004_v54 = vld [vmem:[%s1641_s3 + $0x60] sm:$0xff]  ;;  %v1003_v55 = vld [vmem:[%s1641_s3 + $0x50] sm:$0xff] }
 0xb19   :  { %1027 = vmatpush.msrb.mxu0 %v1004_v54  ;;  %v1000_v60 = vld [vmem:[%s1641_s3 + $0x20] sm:$0xff]  ;;  %v999_v61 = vld [vmem:[%s1641_s3 + $0x10] sm:$0xff] }
 0xb1a   :  { %v1100_v57 = vmul.f32 -1.442695, %v854_v56  ;;  %v1101_v41 = vmul.f32 -1.442695, %v855_v62  ;;  %v1002_v56 = vld [vmem:[%s1641_s3 + $0x40] sm:$0xff] }
 0xb1b   :  { %1028 = vmatpush.msrb.mxu0 %v1003_v55 }
 0xb1c   :  { %1197 = vpow2.f32 %v1100_v57 }
 0xb1d   :  { %1029 = vmatpush.msrb.mxu0 %v1002_v56 }
 0xb22   :  { %v1198_v58 = vpop.eup %1197 }
 0xb23   :  { %v862_v59 = vadd.f32 1.0, %v1198_v58  ;;  %v1001_v58 = vld [vmem:[%s1641_s3 + $0x30] sm:$0xff] }
 0xb24   :  { %1030 = vmatpush.msrb.mxu0 %v1001_v58 }
 0xb25   :  { %1199 = vrcp.f32 %v862_v59  ;;  %v875_v1 = vand.u32 2147483648, %v862_v59  ;;  %v873_v34 = vand.u32 2147483647, %v862_v59  ;;  %vm869_vm1 = vweird.f32 %v862_v59 }
 0xb26   :  { %1201 = vtanh.f32 %v855_v62  ;;  %1031 = vmatpush.msrb.mxu0 %v1000_v60 }
 0xb27   :  { %v876_v4 = vor.u32 1.1754944e-38, %v875_v1  ;;  %vm874_vm3 = vcmp.eq.f32.partialorder %v873_v34, 8.507059e+37  ;;  %1203 = vpow2.f32 %v1101_v41 }
 0xb28   :  { %1032 = vmatpush.msrb.mxu0 %v999_v61 }
 0xb2b   :  { %v1200_v43 = vpop.eup %1199 }
 0xb2c   :  { %v865_v63 = vmul.f32 %v1200_v43, %v862_v59  ;;  %vm870_vm15 = vweird.f32 %v1200_v43  ;;  %v1202_v7 = vpop.eup %1201 }
 0xb2d   :  { %vm871_vm2 = vmor %vm869_vm1, %vm870_vm15  ;;  %v1204_v10 = vpop.eup %1203  ;;  %vm1037_vm1 = vcmask 189440  }
 0xb2e   :  { %v866_v0 = vsub.f32 1.0, %v865_v63  ;;  %v863_v11 = vadd.f32 1.0, %v1204_v10  ;;  %v1106_v10 = vld [vmem:[%s1641_s3 + $0x1] ss:$8 sm:$0x3] }
 0xb30   :  { %v867_v2 = vmul.f32 %v1200_v43, %v866_v0  ;;  %1205 = vrcp.f32 %v863_v11  ;;  %v890_v21 = vand.u32 2147483648, %v863_v11  ;;  %vm884_vm5 = vweird.f32 %v863_v11 }
 0xb31   :  { %v888_v22 = vand.u32 2147483647, %v863_v11 }
 0xb32   :  { %v868_v3 = vadd.f32 %v1200_v43, %v867_v2  ;;  %v891_v24 = vor.u32 1.1754944e-38, %v890_v21 }
 0xb33   :  { %vm889_vm7 = vcmp.eq.f32.partialorder %v888_v22, 8.507059e+37 }
 0xb34   :  { %v872_v5 = vsel %vm871_vm2, %v1200_v43, %v868_v3 }
 0xb35   :  { %v877_v8 = vsel %vm874_vm3, %v876_v4, %v872_v5 }
 0xb36   :  { %v896_v9 = vmul.f32 %v1202_v7, %v877_v8  ;;  %v1206_v13 = vpop.eup %1205  ;;  %v895_v17 = vmul.f32 %v877_v8, %v806_v48 }
 0xb37   :  { %v880_v14 = vmul.f32 %v1206_v13, %v863_v11  ;;  %vm885_vm4 = vweird.f32 %v1206_v13  ;;  %v1010_v11 = vperm.slane %v1106_v10, 0 }
 0xb38   :  { %898 = vrot.lane.b32.xlu1 %v896_v9, %s1276_s1  ;;  %vm886_vm6 = vmor %vm884_vm5, %vm885_vm4 }
 0xb39   :  { %v881_v15 = vsub.f32 1.0, %v880_v14 }
 0xb3b   :  { %v882_v16 = vmul.f32 %v1206_v13, %v881_v15 }
 0xb3d   :  { %v883_v20 = vadd.f32 %v1206_v13, %v882_v16 }
 0xb3f   :  { %v887_v23 = vsel %vm886_vm6, %v1206_v13, %v883_v20 }
 0xb40   :  { %v892_v26 = vsel %vm889_vm7, %v891_v24, %v887_v23 }
 0xbaa   :  { %v899_v18 = vpop.permute.xlu1 %898 }
 0xbab   :  { %v1596_v19 = vadd.f32 %v899_v18, %v895_v17 }
 0xbad   :  { %1207 = vtanh.f32 %v1596_v19 }
 0xbb3   :  { %v1208_v25 = vpop.eup %1207 }
 0xbb4   :  { %v903_v27 = vmul.f32 %v1208_v25, %v892_v26 }
 0xbb6   :  { %905 = vrot.lane.b32.xlu2 %v903_v27, %s1276_s1 }
 0xc10   :  { %v906_v28 = vpop.permute.xlu2 %905 }
 0xc11   :  { %1102 = vmatmul.msk.f32.vlgmr.msrb.gmra.mxu2 %vm236_vm10, %v906_v28  ;;  %1103 = vmatmul.msk.f32.vlgmr.msrb.gmra.mxu3 %vm236_vm10, %v906_v28 }
 0xc94   :  { %v926_v29 = vpop.f32.mrf.mxu2  ;;  %v946_v39 = vpop.f32.mrf.mxu3 }
 0xc95   :  { %v949_v36 = vadd.f32 %v926_v29, %v1326_v6  ;;  %v950_v44 = vadd.f32 %v946_v39, %v1329_v12 }
 0xc97   :  { %v1104_v37 = vmul.f32 -1.442695, %v949_v36  ;;  %v1105_v50 = vmul.f32 -1.442695, %v950_v44 }
 0xc99   :  { %1209 = vpow2.f32 %v1104_v37 }
 0xc9f   :  { %v1210_v35 = vpop.eup %1209 }
 0xca0   :  { %v957_v38 = vadd.f32 1.0, %v1210_v35 }
 0xca2   :  { %1211 = vrcp.f32 %v957_v38  ;;  %v970_v47 = vand.u32 2147483648, %v957_v38  ;;  %v968_v48 = vand.u32 2147483647, %v957_v38  ;;  %vm964_vm9 = vweird.f32 %v957_v38 }
 0xca3   :  { %1213 = vtanh.f32 %v950_v44 }
 0xca4   :  { %v971_v6 = vor.u32 1.1754944e-38, %v970_v47  ;;  %vm969_vm12 = vcmp.eq.f32.partialorder %v968_v48, 8.507059e+37  ;;  %1215 = vpow2.f32 %v1105_v50 }
 0xca8   :  { %v1212_v42 = vpop.eup %1211 }
 0xca9   :  { %v960_v45 = vmul.f32 %v1212_v42, %v957_v38  ;;  %vm965_vm8 = vweird.f32 %v1212_v42  ;;  %v1214_v32 = vpop.eup %1213 }
 0xcaa   :  { %vm966_vm11 = vmor %vm964_vm9, %vm965_vm8  ;;  %v1216_v12 = vpop.eup %1215 }
 0xcab   :  { %v961_v46 = vsub.f32 1.0, %v960_v45  ;;  %v958_v51 = vadd.f32 1.0, %v1216_v12 }
 0xcad   :  { %v962_v40 = vmul.f32 %v1212_v42, %v961_v46  ;;  %1217 = vrcp.f32 %v958_v51  ;;  %v985_v34 = vand.u32 2147483648, %v958_v51  ;;  %vm979_vm14 = vweird.f32 %v958_v51 }
 0xcae   :  { %v983_v3 = vand.u32 2147483647, %v958_v51 }
 0xcaf   :  { %v963_v30 = vadd.f32 %v1212_v42, %v962_v40  ;;  %v986_v5 = vor.u32 1.1754944e-38, %v985_v34 }
 0xcb0   :  { %vm984_vm15 = vcmp.eq.f32.partialorder %v983_v3, 8.507059e+37 }
 0xcb1   :  { %v967_v31 = vsel %vm966_vm11, %v1212_v42, %v963_v30 }
 0xcb2   :  { %v972_v33 = vsel %vm969_vm12, %v971_v6, %v967_v31 }
 0xcb3   :  { %v991_v49 = vmul.f32 %v1214_v32, %v972_v33  ;;  %v1218_v57 = vpop.eup %1217  ;;  %v990_v63 = vmul.f32 %v972_v33, %v1596_v19 }
 0xcb4   :  { %v975_v59 = vmul.f32 %v1218_v57, %v958_v51  ;;  %vm980_vm13 = vweird.f32 %v1218_v57 }
 0xcb5   :  { %993 = vrot.lane.b32.xlu0 %v991_v49, %s1276_s1  ;;  %vm981_vm0 = vmor %vm979_vm14, %vm980_vm13 }
 0xcb6   :  { %v976_v43 = vsub.f32 1.0, %v975_v59 }
 0xcb8   :  { %v977_v62 = vmul.f32 %v1218_v57, %v976_v43 }
 0xcba   :  { %v978_v2 = vadd.f32 %v1218_v57, %v977_v62 }
 0xcbc   :  { %v982_v4 = vsel %vm981_vm0, %v1218_v57, %v978_v2 }
 0xcbd   :  { %v987_v8 = vsel %vm984_vm15, %v986_v5, %v982_v4 }
 0xd27   :  { %v994_v0 = vpop.permute.xlu0 %993 }
 0xd28   :  { %v996_v1 = vadd.f32 %v994_v0, %v990_v63 }
 0xd2a   :  { %1219 = vtanh.f32 %v996_v1 }
 0xd30   :  { %v1220_v7 = vpop.eup %1219 }
 0xd31   :  { %v998_v9 = vmul.f32 %v1220_v7, %v987_v8 }
 0xd33   :  { %1013 = vrot.lane.b32.xlu1 %v998_v9, %s1276_s1 }
 0xda5   :  { %v1014_v41 = vpop.permute.xlu1 %1013 }
 0xda6   :  { %1107 = vmatmul.msk.f32.vlgmr.msrb.gmra.mxu0 %vm236_vm10, %v1014_v41 }
 0xe23   :  { %v1034_v13 = vpop.f32.mrf.mxu0 }
 0xe24   :  { %v1035_v14 = vadd.f32 %v1034_v13, %v1010_v11 }
 0xe26   :  { %1038 = vst.msk [vmem:[#allocation5] sm:$0x3] %vm1037_vm1, %v1035_v14 }
 0xe27   :  { %1049 = dma.vmem_to_hbm [thread:$0]  %s1045_s12, 32, %s1047_s15, [#allocation4]  }
 0xe28   :  { %1271 = dma.done.wait [#allocation4], 32  }
 0xe29   :  { %1272 = vsyncadd [#allocation4], 4294967264 }
 0xe2a   :  { %1054 = vsyncpa [#allocation3], 1 }
 0xe2b   :  { %1055 = vsyncpa [#allocation4], 1 }

</bundles_post_ra>
